<compile_context>
chip_gen: v7x
topology: tpu7x:2x2x1
jax: 0.10.0
libtpu: 0.0.40
codegen_flags: <defaults>
</compile_context>

<pallas_src>
import functools

import jax
import jax.numpy as jnp
from jax import lax
from jax.experimental import pallas as pl
from jax.experimental.pallas import tpu as pltpu


def _round_up(x, m):
    return (x + m - 1) // m * m


def _tpu_hw_params():
    """Best-effort hardware query: (VMEM bytes per core, #TensorCores, kind)."""
    kind = ""
    try:
        kind = jax.devices()[0].device_kind.lower()
    except Exception:
        pass
    vmem_bytes = 64 * 2**20  # conservative default (v7x per-TC budget)
    try:
        vmem_bytes = int(pltpu.get_tpu_info().vmem_capacity_bytes)
    except Exception:
        if ("v5" in kind) or ("v6" in kind):
            vmem_bytes = 128 * 2**20
    num_tc = 2 if "v7" in kind else 1
    return vmem_bytes, num_tc, kind


# ----------------------------------------------------------------------------
# Kernel bodies
# ----------------------------------------------------------------------------
def _prob_mlp_resident_kernel(x_ref, w1_ref, b1_ref, wblk_ref, bblk_ref,
                              wlast_ref, blast_ref, out_ref, *,
                              depth, compute_dtype, unroll_depth):
    """grid = (batch_tiles,); all block weights VMEM-resident, depth loop in-kernel."""
    # First layer.
    y = jnp.dot(x_ref[...], w1_ref[...], preferred_element_type=jnp.float32)
    y = jnp.maximum(y + b1_ref[...], 0.0)

    def blk(d, y):
        h = jnp.dot(y.astype(compute_dtype), wblk_ref[d],
                    preferred_element_type=jnp.float32)
        h = jnp.maximum(h + bblk_ref[d], 0.0)
        return h + y

    if unroll_depth:
        for d in range(depth):          # static indices, fully unrolled
            y = blk(d, y)
    else:
        y = lax.fori_loop(0, depth, blk, y)

    o = jnp.dot(y.astype(compute_dtype), wlast_ref[...],
                preferred_element_type=jnp.float32)
    out_ref[...] = o + blast_ref[...]


def _prob_mlp_streamed_kernel(x_ref, w1_ref, b1_ref, wblk_ref, bblk_ref,
                              wlast_ref, blast_ref, out_ref, y_ref, *,
                              compute_dtype):
    """grid = (batch_tiles, depth); one block weight streamed per depth step."""
    d = pl.program_id(1)

    @pl.when(d == 0)
    def _first():
        y0 = jnp.dot(x_ref[...], w1_ref[...],
                     preferred_element_type=jnp.float32)
        y_ref[...] = jnp.maximum(y0 + b1_ref[...], 0.0)

    # Residual block d (wblk_ref / bblk_ref are 2-D thanks to pl.Squeezed()).
    y = y_ref[...]
    h = jnp.dot(y.astype(compute_dtype), wblk_ref[...],
                preferred_element_type=jnp.float32)
    h = jnp.maximum(h + bblk_ref[...], 0.0)
    y = h + y
    y_ref[...] = y

    @pl.when(d == pl.num_programs(1) - 1)
    def _last():
        o = jnp.dot(y.astype(compute_dtype), wlast_ref[...],
                    preferred_element_type=jnp.float32)
        out_ref[...] = o + blast_ref[...]


# ----------------------------------------------------------------------------
# Wrapper
# ----------------------------------------------------------------------------
def prob_mlp_forward(x, w_first, b_first, w_blocks, b_blocks, w_last, b_last,
                     *, compute_dtype=jnp.bfloat16, tile_b=None):
    """x: (B, input_dims) f32.
    w_first: (input_dims, width), b_first: (width,)
    w_blocks: (depth, width, width), b_blocks: (depth, width)
    w_last: (width, num_classes), b_last: (num_classes,)
    All weights already in (in, out) layout.
    """
    B, input_dims = x.shape
    depth, width, _ = w_blocks.shape
    num_classes = w_last.shape[1]
    assert depth >= 1, "kernel requires at least one residual block"

    # MXU / lane alignment: pad every feature dim to a multiple of 128.
    in_p = _round_up(input_dims, 128)
    w_p = _round_up(width, 128)
    c_p = _round_up(num_classes, 128)
    itm = jnp.dtype(compute_dtype).itemsize

    vmem_bytes, num_tc, kind = _tpu_hw_params()
    vmem_cap = (vmem_bytes * 3) // 4          # ~48 MiB on v7x, ~96 MiB on v5e/v6e

    const_w_bytes = in_p * w_p * itm + w_p * c_p * itm + (w_p + c_p) * 4
    wb_bytes = depth * w_p * w_p * itm + depth * w_p * 4
    # Resident path whenever the whole block-weight stack fits comfortably.
    resident = (wb_bytes + const_w_bytes) <= vmem_cap // 2

    # ---- batch tiling ----
    if tile_b is None:
        if resident:
            tile_b = 512
        elif "v6" in kind:
            tile_b = 768      # streamed weights: v6e weight-DMA roofline ~680 rows
        elif "v7" in kind:
            tile_b = 512
        else:
            tile_b = 256      # v5e is near balance at 256
    b_pad8 = _round_up(max(B, 1), 8)
    tile_b = _round_up(max(8, min(tile_b, b_pad8)), 8)   # adapt to small B

    def vmem_needed(tb):
        act = 2 * tb * in_p * itm + 2 * tb * c_p * 4 + 2 * tb * w_p * 4
        if resident:
            return act + wb_bytes + const_w_bytes
        return act + 3 * (w_p * w_p * itm + w_p * 4) + const_w_bytes

    while tile_b > 8 and vmem_needed(tile_b) > (vmem_cap * 9) // 10:
        tile_b = _round_up(tile_b // 2, 8)
    # v7x: make sure the "parallel" batch axis feeds both TensorCores.
    while num_tc > 1 and tile_b > 8 and pl.cdiv(b_pad8, tile_b) < num_tc:
        tile_b = _round_up(tile_b // 2, 8)

    b_pad = _round_up(b_pad8, tile_b)
    n_btiles = b_pad // tile_b

    # ---- zero-pad inputs/params (exact: padded lanes stay zero end-to-end) ----
    xp = jnp.zeros((b_pad, in_p), compute_dtype).at[:B, :input_dims].set(
        x.astype(compute_dtype))
    w1 = jnp.zeros((in_p, w_p), compute_dtype).at[:input_dims, :width].set(
        w_first.astype(compute_dtype))
    b1 = jnp.zeros((1, w_p), jnp.float32).at[0, :width].set(
        b_first.astype(jnp.float32))
    wb = jnp.zeros((depth, w_p, w_p), compute_dtype).at[:, :width, :width].set(
        w_blocks.astype(compute_dtype))
    bb = jnp.zeros((depth, 1, w_p), jnp.float32).at[:, 0, :width].set(
        b_blocks.astype(jnp.float32))
    wl = jnp.zeros((w_p, c_p), compute_dtype).at[:width, :num_classes].set(
        w_last.astype(compute_dtype))
    bl = jnp.zeros((1, c_p), jnp.float32).at[0, :num_classes].set(
        b_last.astype(jnp.float32))

    # ---- cost estimate (correct weight traffic per path) ----
    flops = 2 * b_pad * (in_p * w_p + depth * w_p * w_p + w_p * c_p)
    wb_reads = 1 if resident else n_btiles
    bytes_accessed = ((xp.size + w1.size + wl.size) * itm
                      + wb_reads * wb.size * itm
                      + (b1.size + wb_reads * bb.size + bl.size) * 4
                      + b_pad * c_p * 4)
    cost = pl.CostEstimate(flops=flops, transcendentals=0,
                           bytes_accessed=bytes_accessed)

    vmem_limit = int(min(max(2 * vmem_needed(tile_b), 32 * 2**20), vmem_cap))
    compiler_params = pltpu.CompilerParams(
        dimension_semantics=(("parallel",) if resident
                             else ("parallel", "arbitrary")),
        vmem_limit_bytes=vmem_limit)

    def run(use_buffered):
        def cspec(shape, imap):
            # Constant-index resident inputs: single-buffer to save VMEM.
            if use_buffered:
                return pl.BlockSpec(shape, imap, pipeline_mode=pl.Buffered(1))
            return pl.BlockSpec(shape, imap)

        if resident:
            kernel = functools.partial(
                _prob_mlp_resident_kernel, depth=depth,
                compute_dtype=compute_dtype, unroll_depth=(depth <= 16))
            in_specs = [
                pl.BlockSpec((tile_b, in_p), lambda bi: (bi, 0)),      # x tile
                cspec((in_p, w_p), lambda bi: (0, 0)),                 # w_first
                cspec((1, w_p), lambda bi: (0, 0)),                    # b_first
                cspec((depth, w_p, w_p), lambda bi: (0, 0, 0)),        # w_blocks (resident)
                cspec((depth, 1, w_p), lambda bi: (0, 0, 0)),          # b_blocks (resident)
                cspec((w_p, c_p), lambda bi: (0, 0)),                  # w_last
                cspec((1, c_p), lambda bi: (0, 0)),                    # b_last
            ]
            out_specs = pl.BlockSpec((tile_b, c_p), lambda bi: (bi, 0))
            grid = (n_btiles,)
            scratch = []
        else:
            kernel = functools.partial(_prob_mlp_streamed_kernel,
                                       compute_dtype=compute_dtype)
            if use_buffered:
                wblk_spec = pl.BlockSpec((pl.Squeezed(), w_p, w_p),
                                         lambda bi, d: (d, 0, 0),
                                         pipeline_mode=pl.Buffered(3))
            else:
                wblk_spec = pl.BlockSpec((pl.Squeezed(), w_p, w_p),
                                         lambda bi, d: (d, 0, 0))
            in_specs = [
                pl.BlockSpec((tile_b, in_p), lambda bi, d: (bi, 0)),   # x tile
                cspec((in_p, w_p), lambda bi, d: (0, 0)),              # w_first
                cspec((1, w_p), lambda bi, d: (0, 0)),                 # b_first
                wblk_spec,                                             # block weight (streamed)
                pl.BlockSpec((pl.Squeezed(), 1, w_p),
                             lambda bi, d: (d, 0, 0)),                 # block bias (streamed)
                cspec((w_p, c_p), lambda bi, d: (0, 0)),               # w_last
                cspec((1, c_p), lambda bi, d: (0, 0)),                 # b_last
            ]
            out_specs = pl.BlockSpec((tile_b, c_p), lambda bi, d: (bi, 0))
            grid = (n_btiles, depth)
            scratch = [pltpu.VMEM((tile_b, w_p), jnp.float32)]

        return pl.pallas_call(
            kernel,
            out_shape=jax.ShapeDtypeStruct((b_pad, c_p), jnp.float32),
            grid=grid,
            in_specs=in_specs,
            out_specs=out_specs,
            scratch_shapes=scratch,
            compiler_params=compiler_params,
            cost_estimate=cost,
        )(xp, w1, b1, wb, bb, wl, bl)

    try:
        out = run(use_buffered=True)
    except Exception:
        # pipeline_mode=pl.Buffered(...) is a pure-VMEM optimization; if this
        # jax build rejects it, fall back to default double buffering.
        out = run(use_buffered=False)

    return out[:B, :num_classes]


# ----------------------------------------------------------------------------
# Pure-JAX reference (dtype-matched to the kernel's MXU operand dtype)
# ----------------------------------------------------------------------------
def prob_mlp_reference(x, w_first, b_first, w_blocks, b_blocks, w_last, b_last,
                       compute_dtype=jnp.float32):
    def mm(a, w):
        return jnp.dot(a.astype(compute_dtype), w.astype(compute_dtype),
                       preferred_element_type=jnp.float32)
    y = jax.nn.relu(mm(x, w_first) + b_first)
    for i in range(w_blocks.shape[0]):
        y = jax.nn.relu(mm(y, w_blocks[i]) + b_blocks[i]) + y
    return mm(y, w_last) + b_last


def _linear_init(key, fan_in, fan_out):
    # PyTorch nn.Linear default init: U(-1/sqrt(fan_in), 1/sqrt(fan_in)).
    kw, kb = jax.random.split(key)
    bound = 1.0 / jnp.sqrt(jnp.float32(fan_in))
    # Stored directly in (in, out) layout (transpose of torch's (out, in)).
    w = jax.random.uniform(kw, (fan_in, fan_out), jnp.float32, -bound, bound)
    b = jax.random.uniform(kb, (fan_out,), jnp.float32, -bound, bound)
    return w, b


if __name__ == "__main__":
    # Small shapes consistent with prob_mlp(input_dims, num_classes, depth, width).
    batch = 8
    input_dims = 32
    width = 32
    num_classes = 10
    depth = 4

    key = jax.random.PRNGKey(0)
    kx, k1, kb, kl = jax.random.split(key, 4)

    x = jax.random.normal(kx, (batch, input_dims), jnp.float32)

    w_first, b_first = _linear_init(k1, input_dims, width)

    blk_keys = jax.random.split(kb, depth)
    wbs, bbs = [], []
    for i in range(depth):
        w, b = _linear_init(blk_keys[i], width, width)
        wbs.append(w)
        bbs.append(b)
    w_blocks = jnp.stack(wbs)  # (depth, width, width)
    b_blocks = jnp.stack(bbs)  # (depth, width)

    w_last, b_last = _linear_init(kl, width, num_classes)

    params = (w_first, b_first, w_blocks, b_blocks, w_last, b_last)

    # bf16-operand path (production config): check against a dtype-matched ref.
    out_bf16 = prob_mlp_forward(x, *params, compute_dtype=jnp.bfloat16)
    out_bf16 = jax.block_until_ready(out_bf16)
    ref_bf16 = prob_mlp_reference(x, *params, compute_dtype=jnp.bfloat16)
    assert out_bf16.shape == (batch, num_classes)
    assert jnp.allclose(out_bf16, ref_bf16, atol=2e-3, rtol=2e-3), \
        "bf16 kernel mismatch vs dtype-matched JAX reference"

    # f32-operand path: tight check against the f32 reference.
    out_f32 = prob_mlp_forward(x, *params, compute_dtype=jnp.float32)
    out_f32 = jax.block_until_ready(out_f32)
    ref_f32 = prob_mlp_reference(x, *params, compute_dtype=jnp.float32)
    assert jnp.allclose(out_f32, ref_f32, atol=2e-3, rtol=2e-3), \
        "f32 kernel mismatch vs JAX reference"

    print("KERNEL_OK")
</pallas_src>

<mosaic_0001>
module attributes {stable_mosaic.version = 11 : i64} {
  func.func @_prob_mlp_resident_kernel(%arg0: i32, %arg1: memref<8x128xbf16, #tpu.memory_space<vmem>>, %arg2: memref<128x128xbf16, #tpu.memory_space<vmem>>, %arg3: memref<1x128xf32, #tpu.memory_space<vmem>>, %arg4: memref<4x128x128xbf16, #tpu.memory_space<vmem>>, %arg5: memref<4x1x128xf32, #tpu.memory_space<vmem>>, %arg6: memref<128x128xbf16, #tpu.memory_space<vmem>>, %arg7: memref<1x128xf32, #tpu.memory_space<vmem>>, %arg8: memref<8x128xf32, #tpu.memory_space<vmem>>) attributes {dimension_semantics = [#tpu.dimension_semantics<parallel>], iteration_bounds = array<i64: 1>, scalar_prefetch = 0 : i64, scratch_operands = 0 : i64, tpu.core_type = #tpu.core_type<tc>, window_params = [{transform_indices = @transform_0, window_bounds = array<i64: 8, 128>}, {pipeline_mode = #tpu.pipeline_mode<synchronous>, transform_indices = @transform_1, window_bounds = array<i64: 128, 128>}, {pipeline_mode = #tpu.pipeline_mode<synchronous>, transform_indices = @transform_2, window_bounds = array<i64: 1, 128>}, {pipeline_mode = #tpu.pipeline_mode<synchronous>, transform_indices = @transform_3, window_bounds = array<i64: 4, 128, 128>}, {pipeline_mode = #tpu.pipeline_mode<synchronous>, transform_indices = @transform_4, window_bounds = array<i64: 4, 1, 128>}, {pipeline_mode = #tpu.pipeline_mode<synchronous>, transform_indices = @transform_5, window_bounds = array<i64: 128, 128>}, {pipeline_mode = #tpu.pipeline_mode<synchronous>, transform_indices = @transform_6, window_bounds = array<i64: 1, 128>}, {transform_indices = @transform_7, window_bounds = array<i64: 8, 128>}]} {
    %c0 = arith.constant 0 : index
    %c0_0 = arith.constant 0 : index
    %0 = vector.load %arg1[%c0, %c0_0] : memref<8x128xbf16, #tpu.memory_space<vmem>>, vector<8x128xbf16>
    %c0_1 = arith.constant 0 : index
    %c0_2 = arith.constant 0 : index
    %1 = vector.load %arg2[%c0_1, %c0_2] : memref<128x128xbf16, #tpu.memory_space<vmem>>, vector<128x128xbf16>
    %cst = arith.constant dense<0.000000e+00> : vector<8x128xf32>
    %2 = tpu.matmul %0, %1, %cst {dimension_numbers = #tpu.dot_dimension_numbers<[1], [0], [0], [1], [0, 0, 1, 1], [], []>} : vector<8x128xbf16>, vector<128x128xbf16>, vector<8x128xf32> -> vector<8x128xf32>
    %c0_3 = arith.constant 0 : index
    %c0_4 = arith.constant 0 : index
    %3 = vector.load %arg3[%c0_3, %c0_4] : memref<1x128xf32, #tpu.memory_space<vmem>>, vector<1x128xf32>
    %4 = vector.broadcast %3 : vector<1x128xf32> to vector<8x128xf32>
    %5 = arith.addf %2, %4 : vector<8x128xf32>
    %cst_5 = arith.constant 0.000000e+00 : f32
    %6 = vector.broadcast %cst_5 : f32 to vector<8x128xf32>
    %7 = arith.maximumf %5, %6 : vector<8x128xf32>
    %8 = arith.truncf %7 : vector<8x128xf32> to vector<8x128xbf16>
    %c0_6 = arith.constant 0 : index
    %c0_7 = arith.constant 0 : index
    %c0_8 = arith.constant 0 : index
    %9 = vector.load %arg4[%c0_6, %c0_7, %c0_8] : memref<4x128x128xbf16, #tpu.memory_space<vmem>>, vector<1x128x128xbf16>
    %10 = vector.shape_cast %9 : vector<1x128x128xbf16> to vector<128x128xbf16>
    %cst_9 = arith.constant dense<0.000000e+00> : vector<8x128xf32>
    %11 = tpu.matmul %8, %10, %cst_9 {dimension_numbers = #tpu.dot_dimension_numbers<[1], [0], [0], [1], [0, 0, 1, 1], [], []>} : vector<8x128xbf16>, vector<128x128xbf16>, vector<8x128xf32> -> vector<8x128xf32>
    %c0_10 = arith.constant 0 : index
    %c0_11 = arith.constant 0 : index
    %c0_12 = arith.constant 0 : index
    %12 = vector.load %arg5[%c0_10, %c0_11, %c0_12] : memref<4x1x128xf32, #tpu.memory_space<vmem>>, vector<1x1x128xf32>
    %13 = vector.shape_cast %12 : vector<1x1x128xf32> to vector<1x128xf32>
    %14 = vector.broadcast %13 : vector<1x128xf32> to vector<8x128xf32>
    %15 = arith.addf %11, %14 : vector<8x128xf32>
    %cst_13 = arith.constant 0.000000e+00 : f32
    %16 = vector.broadcast %cst_13 : f32 to vector<8x128xf32>
    %17 = arith.maximumf %15, %16 : vector<8x128xf32>
    %18 = arith.addf %17, %7 : vector<8x128xf32>
    %19 = arith.truncf %18 : vector<8x128xf32> to vector<8x128xbf16>
    %c1 = arith.constant 1 : index
    %c0_14 = arith.constant 0 : index
    %c0_15 = arith.constant 0 : index
    %20 = vector.load %arg4[%c1, %c0_14, %c0_15] : memref<4x128x128xbf16, #tpu.memory_space<vmem>>, vector<1x128x128xbf16>
    %21 = vector.shape_cast %20 : vector<1x128x128xbf16> to vector<128x128xbf16>
    %cst_16 = arith.constant dense<0.000000e+00> : vector<8x128xf32>
    %22 = tpu.matmul %19, %21, %cst_16 {dimension_numbers = #tpu.dot_dimension_numbers<[1], [0], [0], [1], [0, 0, 1, 1], [], []>} : vector<8x128xbf16>, vector<128x128xbf16>, vector<8x128xf32> -> vector<8x128xf32>
    %c1_17 = arith.constant 1 : index
    %c0_18 = arith.constant 0 : index
    %c0_19 = arith.constant 0 : index
    %23 = vector.load %arg5[%c1_17, %c0_18, %c0_19] : memref<4x1x128xf32, #tpu.memory_space<vmem>>, vector<1x1x128xf32>
    %24 = vector.shape_cast %23 : vector<1x1x128xf32> to vector<1x128xf32>
    %25 = vector.broadcast %24 : vector<1x128xf32> to vector<8x128xf32>
    %26 = arith.addf %22, %25 : vector<8x128xf32>
    %cst_20 = arith.constant 0.000000e+00 : f32
    %27 = vector.broadcast %cst_20 : f32 to vector<8x128xf32>
    %28 = arith.maximumf %26, %27 : vector<8x128xf32>
    %29 = arith.addf %28, %18 : vector<8x128xf32>
    %30 = arith.truncf %29 : vector<8x128xf32> to vector<8x128xbf16>
    %c2 = arith.constant 2 : index
    %c0_21 = arith.constant 0 : index
    %c0_22 = arith.constant 0 : index
    %31 = vector.load %arg4[%c2, %c0_21, %c0_22] : memref<4x128x128xbf16, #tpu.memory_space<vmem>>, vector<1x128x128xbf16>
    %32 = vector.shape_cast %31 : vector<1x128x128xbf16> to vector<128x128xbf16>
    %cst_23 = arith.constant dense<0.000000e+00> : vector<8x128xf32>
    %33 = tpu.matmul %30, %32, %cst_23 {dimension_numbers = #tpu.dot_dimension_numbers<[1], [0], [0], [1], [0, 0, 1, 1], [], []>} : vector<8x128xbf16>, vector<128x128xbf16>, vector<8x128xf32> -> vector<8x128xf32>
    %c2_24 = arith.constant 2 : index
    %c0_25 = arith.constant 0 : index
    %c0_26 = arith.constant 0 : index
    %34 = vector.load %arg5[%c2_24, %c0_25, %c0_26] : memref<4x1x128xf32, #tpu.memory_space<vmem>>, vector<1x1x128xf32>
    %35 = vector.shape_cast %34 : vector<1x1x128xf32> to vector<1x128xf32>
    %36 = vector.broadcast %35 : vector<1x128xf32> to vector<8x128xf32>
    %37 = arith.addf %33, %36 : vector<8x128xf32>
    %cst_27 = arith.constant 0.000000e+00 : f32
    %38 = vector.broadcast %cst_27 : f32 to vector<8x128xf32>
    %39 = arith.maximumf %37, %38 : vector<8x128xf32>
    %40 = arith.addf %39, %29 : vector<8x128xf32>
    %41 = arith.truncf %40 : vector<8x128xf32> to vector<8x128xbf16>
    %c3 = arith.constant 3 : index
    %c0_28 = arith.constant 0 : index
    %c0_29 = arith.constant 0 : index
    %42 = vector.load %arg4[%c3, %c0_28, %c0_29] : memref<4x128x128xbf16, #tpu.memory_space<vmem>>, vector<1x128x128xbf16>
    %43 = vector.shape_cast %42 : vector<1x128x128xbf16> to vector<128x128xbf16>
    %cst_30 = arith.constant dense<0.000000e+00> : vector<8x128xf32>
    %44 = tpu.matmul %41, %43, %cst_30 {dimension_numbers = #tpu.dot_dimension_numbers<[1], [0], [0], [1], [0, 0, 1, 1], [], []>} : vector<8x128xbf16>, vector<128x128xbf16>, vector<8x128xf32> -> vector<8x128xf32>
    %c3_31 = arith.constant 3 : index
    %c0_32 = arith.constant 0 : index
    %c0_33 = arith.constant 0 : index
    %45 = vector.load %arg5[%c3_31, %c0_32, %c0_33] : memref<4x1x128xf32, #tpu.memory_space<vmem>>, vector<1x1x128xf32>
    %46 = vector.shape_cast %45 : vector<1x1x128xf32> to vector<1x128xf32>
    %47 = vector.broadcast %46 : vector<1x128xf32> to vector<8x128xf32>
    %48 = arith.addf %44, %47 : vector<8x128xf32>
    %cst_34 = arith.constant 0.000000e+00 : f32
    %49 = vector.broadcast %cst_34 : f32 to vector<8x128xf32>
    %50 = arith.maximumf %48, %49 : vector<8x128xf32>
    %51 = arith.addf %50, %40 : vector<8x128xf32>
    %52 = arith.truncf %51 : vector<8x128xf32> to vector<8x128xbf16>
    %c0_35 = arith.constant 0 : index
    %c0_36 = arith.constant 0 : index
    %53 = vector.load %arg6[%c0_35, %c0_36] : memref<128x128xbf16, #tpu.memory_space<vmem>>, vector<128x128xbf16>
    %cst_37 = arith.constant dense<0.000000e+00> : vector<8x128xf32>
    %54 = tpu.matmul %52, %53, %cst_37 {dimension_numbers = #tpu.dot_dimension_numbers<[1], [0], [0], [1], [0, 0, 1, 1], [], []>} : vector<8x128xbf16>, vector<128x128xbf16>, vector<8x128xf32> -> vector<8x128xf32>
    %c0_38 = arith.constant 0 : index
    %c0_39 = arith.constant 0 : index
    %55 = vector.load %arg7[%c0_38, %c0_39] : memref<1x128xf32, #tpu.memory_space<vmem>>, vector<1x128xf32>
    %56 = vector.broadcast %55 : vector<1x128xf32> to vector<8x128xf32>
    %57 = arith.addf %54, %56 : vector<8x128xf32>
    %c0_40 = arith.constant 0 : index
    %c0_41 = arith.constant 0 : index
    %58 = vector.load %arg8[%c0_40, %c0_41] : memref<8x128xf32, #tpu.memory_space<vmem>>, vector<8x128xf32>
    tpu.vector_store %arg8[%c0_40, %c0_41], %57 {strides = array<i32>} : memref<8x128xf32, #tpu.memory_space<vmem>>, vector<8x128xf32>,
    return
  }
  func.func @transform_0(%arg0: i32) -> (i32, i32) {
    %c0_i32 = arith.constant 0 : i32
    %c0_i32_0 = arith.constant 0 : i32
    return %arg0, %c0_i32 : i32, i32
  }
  func.func @transform_1(%arg0: i32) -> (i32, i32) {
    %c0_i32 = arith.constant 0 : i32
    %c0_i32_0 = arith.constant 0 : i32
    %c0_i32_1 = arith.constant 0 : i32
    return %c0_i32, %c0_i32_0 : i32, i32
  }
  func.func @transform_2(%arg0: i32) -> (i32, i32) {
    %c0_i32 = arith.constant 0 : i32
    %c0_i32_0 = arith.constant 0 : i32
    %c0_i32_1 = arith.constant 0 : i32
    return %c0_i32, %c0_i32_0 : i32, i32
  }
  func.func @transform_3(%arg0: i32) -> (i32, i32, i32) {
    %c0_i32 = arith.constant 0 : i32
    %c0_i32_0 = arith.constant 0 : i32
    %c0_i32_1 = arith.constant 0 : i32
    %c0_i32_2 = arith.constant 0 : i32
    return %c0_i32, %c0_i32_0, %c0_i32_1 : i32, i32, i32
  }
  func.func @transform_4(%arg0: i32) -> (i32, i32, i32) {
    %c0_i32 = arith.constant 0 : i32
    %c0_i32_0 = arith.constant 0 : i32
    %c0_i32_1 = arith.constant 0 : i32
    %c0_i32_2 = arith.constant 0 : i32
    return %c0_i32, %c0_i32_0, %c0_i32_1 : i32, i32, i32
  }
  func.func @transform_5(%arg0: i32) -> (i32, i32) {
    %c0_i32 = arith.constant 0 : i32
    %c0_i32_0 = arith.constant 0 : i32
    %c0_i32_1 = arith.constant 0 : i32
    return %c0_i32, %c0_i32_0 : i32, i32
  }
  func.func @transform_6(%arg0: i32) -> (i32, i32) {
    %c0_i32 = arith.constant 0 : i32
    %c0_i32_0 = arith.constant 0 : i32
    %c0_i32_1 = arith.constant 0 : i32
    return %c0_i32, %c0_i32_0 : i32, i32
  }
  func.func @transform_7(%arg0: i32) -> (i32, i32) {
    %c0_i32 = arith.constant 0 : i32
    %c0_i32_0 = arith.constant 0 : i32
    return %arg0, %c0_i32 : i32, i32
  }
}

module attributes {stable_mosaic.version = 11 : i64} {
  func.func @_prob_mlp_resident_kernel(%arg0: i32, %arg1: memref<8x128xbf16, #tpu.memory_space<vmem>>, %arg2: memref<128x128xbf16, #tpu.memory_space<vmem>>, %arg3: memref<1x128xf32, #tpu.memory_space<vmem>>, %arg4: memref<4x128x128xbf16, #tpu.memory_space<vmem>>, %arg5: memref<4x1x128xf32, #tpu.memory_space<vmem>>, %arg6: memref<128x128xbf16, #tpu.memory_space<vmem>>, %arg7: memref<1x128xf32, #tpu.memory_space<vmem>>, %arg8: memref<8x128xf32, #tpu.memory_space<vmem>>) attributes {dimension_semantics = [#tpu.dimension_semantics<parallel>], iteration_bounds = array<i64: 1>, scalar_prefetch = 0 : i64, scratch_operands = 0 : i64, tpu.core_type = #tpu.core_type<tc>, window_params = [{transform_indices = @transform_0, window_bounds = array<i64: 8, 128>}, {pipeline_mode = #tpu.pipeline_mode<synchronous>, transform_indices = @transform_1, window_bounds = array<i64: 128, 128>}, {pipeline_mode = #tpu.pipeline_mode<synchronous>, transform_indices = @transform_2, window_bounds = array<i64: 1, 128>}, {pipeline_mode = #tpu.pipeline_mode<synchronous>, transform_indices = @transform_3, window_bounds = array<i64: 4, 128, 128>}, {pipeline_mode = #tpu.pipeline_mode<synchronous>, transform_indices = @transform_4, window_bounds = array<i64: 4, 1, 128>}, {pipeline_mode = #tpu.pipeline_mode<synchronous>, transform_indices = @transform_5, window_bounds = array<i64: 128, 128>}, {pipeline_mode = #tpu.pipeline_mode<synchronous>, transform_indices = @transform_6, window_bounds = array<i64: 1, 128>}, {transform_indices = @transform_7, window_bounds = array<i64: 8, 128>}]} {
    %c0 = arith.constant 0 : index
    %c0_0 = arith.constant 0 : index
    %0 = vector.load %arg1[%c0, %c0_0] : memref<8x128xbf16, #tpu.memory_space<vmem>>, vector<8x128xbf16>
    %c0_1 = arith.constant 0 : index
    %c0_2 = arith.constant 0 : index
    %1 = vector.load %arg2[%c0_1, %c0_2] : memref<128x128xbf16, #tpu.memory_space<vmem>>, vector<128x128xbf16>
    %cst = arith.constant dense<0.000000e+00> : vector<8x128xf32>
    %2 = tpu.matmul %0, %1, %cst {dimension_numbers = #tpu.dot_dimension_numbers<[1], [0], [0], [1], [0, 0, 1, 1], [], []>} : vector<8x128xbf16>, vector<128x128xbf16>, vector<8x128xf32> -> vector<8x128xf32>
    %c0_3 = arith.constant 0 : index
    %c0_4 = arith.constant 0 : index
    %3 = vector.load %arg3[%c0_3, %c0_4] : memref<1x128xf32, #tpu.memory_space<vmem>>, vector<1x128xf32>
    %4 = vector.broadcast %3 : vector<1x128xf32> to vector<8x128xf32>
    %5 = arith.addf %2, %4 : vector<8x128xf32>
    %cst_5 = arith.constant 0.000000e+00 : f32
    %6 = vector.broadcast %cst_5 : f32 to vector<8x128xf32>
    %7 = arith.maximumf %5, %6 : vector<8x128xf32>
    %8 = arith.truncf %7 : vector<8x128xf32> to vector<8x128xbf16>
    %c0_6 = arith.constant 0 : index
    %c0_7 = arith.constant 0 : index
    %c0_8 = arith.constant 0 : index
    %9 = vector.load %arg4[%c0_6, %c0_7, %c0_8] : memref<4x128x128xbf16, #tpu.memory_space<vmem>>, vector<1x128x128xbf16>
    %10 = vector.shape_cast %9 : vector<1x128x128xbf16> to vector<128x128xbf16>
    %cst_9 = arith.constant dense<0.000000e+00> : vector<8x128xf32>
    %11 = tpu.matmul %8, %10, %cst_9 {dimension_numbers = #tpu.dot_dimension_numbers<[1], [0], [0], [1], [0, 0, 1, 1], [], []>} : vector<8x128xbf16>, vector<128x128xbf16>, vector<8x128xf32> -> vector<8x128xf32>
    %c0_10 = arith.constant 0 : index
    %c0_11 = arith.constant 0 : index
    %c0_12 = arith.constant 0 : index
    %12 = vector.load %arg5[%c0_10, %c0_11, %c0_12] : memref<4x1x128xf32, #tpu.memory_space<vmem>>, vector<1x1x128xf32>
    %13 = vector.shape_cast %12 : vector<1x1x128xf32> to vector<1x128xf32>
    %14 = vector.broadcast %13 : vector<1x128xf32> to vector<8x128xf32>
    %15 = arith.addf %11, %14 : vector<8x128xf32>
    %cst_13 = arith.constant 0.000000e+00 : f32
    %16 = vector.broadcast %cst_13 : f32 to vector<8x128xf32>
    %17 = arith.maximumf %15, %16 : vector<8x128xf32>
    %18 = arith.addf %17, %7 : vector<8x128xf32>
    %19 = arith.truncf %18 : vector<8x128xf32> to vector<8x128xbf16>
    %c1 = arith.constant 1 : index
    %c0_14 = arith.constant 0 : index
    %c0_15 = arith.constant 0 : index
    %20 = vector.load %arg4[%c1, %c0_14, %c0_15] : memref<4x128x128xbf16, #tpu.memory_space<vmem>>, vector<1x128x128xbf16>
    %21 = vector.shape_cast %20 : vector<1x128x128xbf16> to vector<128x128xbf16>
    %cst_16 = arith.constant dense<0.000000e+00> : vector<8x128xf32>
    %22 = tpu.matmul %19, %21, %cst_16 {dimension_numbers = #tpu.dot_dimension_numbers<[1], [0], [0], [1], [0, 0, 1, 1], [], []>} : vector<8x128xbf16>, vector<128x128xbf16>, vector<8x128xf32> -> vector<8x128xf32>
    %c1_17 = arith.constant 1 : index
    %c0_18 = arith.constant 0 : index
    %c0_19 = arith.constant 0 : index
    %23 = vector.load %arg5[%c1_17, %c0_18, %c0_19] : memref<4x1x128xf32, #tpu.memory_space<vmem>>, vector<1x1x128xf32>
    %24 = vector.shape_cast %23 : vector<1x1x128xf32> to vector<1x128xf32>
    %25 = vector.broadcast %24 : vector<1x128xf32> to vector<8x128xf32>
    %26 = arith.addf %22, %25 : vector<8x128xf32>
    %cst_20 = arith.constant 0.000000e+00 : f32
    %27 = vector.broadcast %cst_20 : f32 to vector<8x128xf32>
    %28 = arith.maximumf %26, %27 : vector<8x128xf32>
    %29 = arith.addf %28, %18 : vector<8x128xf32>
    %30 = arith.truncf %29 : vector<8x128xf32> to vector<8x128xbf16>
    %c2 = arith.constant 2 : index
    %c0_21 = arith.constant 0 : index
    %c0_22 = arith.constant 0 : index
    %31 = vector.load %arg4[%c2, %c0_21, %c0_22] : memref<4x128x128xbf16, #tpu.memory_space<vmem>>, vector<1x128x128xbf16>
    %32 = vector.shape_cast %31 : vector<1x128x128xbf16> to vector<128x128xbf16>
    %cst_23 = arith.constant dense<0.000000e+00> : vector<8x128xf32>
    %33 = tpu.matmul %30, %32, %cst_23 {dimension_numbers = #tpu.dot_dimension_numbers<[1], [0], [0], [1], [0, 0, 1, 1], [], []>} : vector<8x128xbf16>, vector<128x128xbf16>, vector<8x128xf32> -> vector<8x128xf32>
    %c2_24 = arith.constant 2 : index
    %c0_25 = arith.constant 0 : index
    %c0_26 = arith.constant 0 : index
    %34 = vector.load %arg5[%c2_24, %c0_25, %c0_26] : memref<4x1x128xf32, #tpu.memory_space<vmem>>, vector<1x1x128xf32>
    %35 = vector.shape_cast %34 : vector<1x1x128xf32> to vector<1x128xf32>
    %36 = vector.broadcast %35 : vector<1x128xf32> to vector<8x128xf32>
    %37 = arith.addf %33, %36 : vector<8x128xf32>
    %cst_27 = arith.constant 0.000000e+00 : f32
    %38 = vector.broadcast %cst_27 : f32 to vector<8x128xf32>
    %39 = arith.maximumf %37, %38 : vector<8x128xf32>
    %40 = arith.addf %39, %29 : vector<8x128xf32>
    %41 = arith.truncf %40 : vector<8x128xf32> to vector<8x128xbf16>
    %c3 = arith.constant 3 : index
    %c0_28 = arith.constant 0 : index
    %c0_29 = arith.constant 0 : index
    %42 = vector.load %arg4[%c3, %c0_28, %c0_29] : memref<4x128x128xbf16, #tpu.memory_space<vmem>>, vector<1x128x128xbf16>
    %43 = vector.shape_cast %42 : vector<1x128x128xbf16> to vector<128x128xbf16>
    %cst_30 = arith.constant dense<0.000000e+00> : vector<8x128xf32>
    %44 = tpu.matmul %41, %43, %cst_30 {dimension_numbers = #tpu.dot_dimension_numbers<[1], [0], [0], [1], [0, 0, 1, 1], [], []>} : vector<8x128xbf16>, vector<128x128xbf16>, vector<8x128xf32> -> vector<8x128xf32>
    %c3_31 = arith.constant 3 : index
    %c0_32 = arith.constant 0 : index
    %c0_33 = arith.constant 0 : index
    %45 = vector.load %arg5[%c3_31, %c0_32, %c0_33] : memref<4x1x128xf32, #tpu.memory_space<vmem>>, vector<1x1x128xf32>
    %46 = vector.shape_cast %45 : vector<1x1x128xf32> to vector<1x128xf32>
    %47 = vector.broadcast %46 : vector<1x128xf32> to vector<8x128xf32>
    %48 = arith.addf %44, %47 : vector<8x128xf32>
    %cst_34 = arith.constant 0.000000e+00 : f32
    %49 = vector.broadcast %cst_34 : f32 to vector<8x128xf32>
    %50 = arith.maximumf %48, %49 : vector<8x128xf32>
    %51 = arith.addf %50, %40 : vector<8x128xf32>
    %52 = arith.truncf %51 : vector<8x128xf32> to vector<8x128xbf16>
    %c0_35 = arith.constant 0 : index
    %c0_36 = arith.constant 0 : index
    %53 = vector.load %arg6[%c0_35, %c0_36] : memref<128x128xbf16, #tpu.memory_space<vmem>>, vector<128x128xbf16>
    %cst_37 = arith.constant dense<0.000000e+00> : vector<8x128xf32>
    %54 = tpu.matmul %52, %53, %cst_37 {dimension_numbers = #tpu.dot_dimension_numbers<[1], [0], [0], [1], [0, 0, 1, 1], [], []>} : vector<8x128xbf16>, vector<128x128xbf16>, vector<8x128xf32> -> vector<8x128xf32>
    %c0_38 = arith.constant 0 : index
    %c0_39 = arith.constant 0 : index
    %55 = vector.load %arg7[%c0_38, %c0_39] : memref<1x128xf32, #tpu.memory_space<vmem>>, vector<1x128xf32>
    %56 = vector.broadcast %55 : vector<1x128xf32> to vector<8x128xf32>
    %57 = arith.addf %54, %56 : vector<8x128xf32>
    %c0_40 = arith.constant 0 : index
    %c0_41 = arith.constant 0 : index
    %58 = vector.load %arg8[%c0_40, %c0_41] : memref<8x128xf32, #tpu.memory_space<vmem>>, vector<8x128xf32>
    tpu.vector_store %arg8[%c0_40, %c0_41], %57 {strides = array<i32>} : memref<8x128xf32, #tpu.memory_space<vmem>>, vector<8x128xf32>,
    return
  }
  func.func @transform_0(%arg0: i32) -> (i32, i32) {
    %c0_i32 = arith.constant 0 : i32
    %c0_i32_0 = arith.constant 0 : i32
    return %arg0, %c0_i32 : i32, i32
  }
  func.func @transform_1(%arg0: i32) -> (i32, i32) {
    %c0_i32 = arith.constant 0 : i32
    %c0_i32_0 = arith.constant 0 : i32
    %c0_i32_1 = arith.constant 0 : i32
    return %c0_i32, %c0_i32_0 : i32, i32
  }
  func.func @transform_2(%arg0: i32) -> (i32, i32) {
    %c0_i32 = arith.constant 0 : i32
    %c0_i32_0 = arith.constant 0 : i32
    %c0_i32_1 = arith.constant 0 : i32
    return %c0_i32, %c0_i32_0 : i32, i32
  }
  func.func @transform_3(%arg0: i32) -> (i32, i32, i32) {
    %c0_i32 = arith.constant 0 : i32
    %c0_i32_0 = arith.constant 0 : i32
    %c0_i32_1 = arith.constant 0 : i32
    %c0_i32_2 = arith.constant 0 : i32
    return %c0_i32, %c0_i32_0, %c0_i32_1 : i32, i32, i32
  }
  func.func @transform_4(%arg0: i32) -> (i32, i32, i32) {
    %c0_i32 = arith.constant 0 : i32
    %c0_i32_0 = arith.constant 0 : i32
    %c0_i32_1 = arith.constant 0 : i32
    %c0_i32_2 = arith.constant 0 : i32
    return %c0_i32, %c0_i32_0, %c0_i32_1 : i32, i32, i32
  }
  func.func @transform_5(%arg0: i32) -> (i32, i32) {
    %c0_i32 = arith.constant 0 : i32
    %c0_i32_0 = arith.constant 0 : i32
    %c0_i32_1 = arith.constant 0 : i32
    return %c0_i32, %c0_i32_0 : i32, i32
  }
  func.func @transform_6(%arg0: i32) -> (i32, i32) {
    %c0_i32 = arith.constant 0 : i32
    %c0_i32_0 = arith.constant 0 : i32
    %c0_i32_1 = arith.constant 0 : i32
    return %c0_i32, %c0_i32_0 : i32, i32
  }
  func.func @transform_7(%arg0: i32) -> (i32, i32) {
    %c0_i32 = arith.constant 0 : i32
    %c0_i32_0 = arith.constant 0 : i32
    return %arg0, %c0_i32 : i32, i32
  }
}

</mosaic_0001>

<bundles_post_ra>
// kernel: tpu_custom_call.1
= control target key start
LH: loop header
LB: loop body
LE: loop exit
PB: predicated region body
PF: predicated region fallthrough
CT: control target
= control target key end

     0   :  { %12 = vsyncpa [#allocation3], 0  ;;  %s1388_s0 = inlined_call_operand.hbm [shape: bf16[8,128], index: 0, kind: input, shape index: {}]   ;;  %s1389_s1 = inlined_call_operand.hbm [shape: bf16[128,128], index: 1, kind: input, shape index: {}]   ;;  %s1390_s2 = inlined_call_operand.vmem [shape: f32[1,128], index: 2, kind: input, shape index: {}]   ;;  %s1391_s3 = inlined_call_operand.hbm [shape: bf16[4,128,128], index: 3, kind: input, shape index: {}]   ;;  %s1392_s4 = inlined_call_operand.vmem [shape: f32[4,1,128], index: 4, kind: input, shape index: {}]   ;;  %s1393_s5 = inlined_call_operand.hbm [shape: bf16[128,128], index: 5, kind: input, shape index: {}]   ;;  %s1394_s6 = inlined_call_operand.vmem [shape: f32[1,128], index: 6, kind: input, shape index: {}]   ;;  %s1395_s7 = inlined_call_operand.hbm [shape: f32[8,128], index: 7, kind: output, shape index: {}]  }
   0x1   :  { %13 = vsyncpa [#allocation6], 0 }
   0x2   :  { %14 = vsyncpa [#allocation9], 0 }
   0x3   :  { %15 = vsyncpa [#allocation4], 0  ;;  %s1192_s24 = smov [#allocation5]   ;;  %s1074_s28 = scalar_lea.hbm %s1389_s1, 1024 }
   0x4   :  { %s31_s25 = sshll.u32 %s1192_s24, 4  ;;  %p1075_p0 = scmp.ne.s32.totalorder %s1389_s1, %s1074_s28  ;;  %s32_s25 = int_to_ptr.vmem [resolvable:$true] %s31_s25 }
   0x5   :  { %p1078_p1 = scmp.lt.u32.totalorder %s1074_s28, %s1389_s1 }
   0x7   :  { %p1080_p2 = pnand %p1078_p1, %p1075_p0 }
   0x9   :  { %1083 = shalt.err (!%p1080_p2)
}
   0xa   :  { %s1084_s10 = scalar_lea.vmem %s32_s25, 1024  ;;  %p1089_p4 = scmp.lt.s32.totalorder %s32_s25, %s32_s25 }
   0xb   :  { %p1085_p3 = scmp.ne.s32.totalorder %s32_s25, %s1084_s10  ;;  %p1090_p5 = scmp.lt.s32.totalorder %s1084_s10, %s1084_s10 }
   0xd   :  { %p1091_p6 = por %p1090_p5, %p1089_p4 }
   0xf   :  { %p1092_p7 = pnand %p1091_p6, %p1085_p3 }
  0x11   :  { %1095 = shalt.err (!%p1092_p7)
}
  0x12   :  { %s1193_s11 = smov 64   ;;  %s1194_s12 = smov 4  }
  0x13   :  { %37 = dma.hbm_to_vmem [thread:$0]  %s1389_s1, 1024, %s32_s25, [#allocation6], %s1193_s11, %s1193_s11, %s1194_s12  }
  0x14   :  { %s1195_s15 = smov [#allocation2]   ;;  %s1196_s17 = smov [#allocation7]  }
  0x15   :  { %s22_s16 = sshll.u32 %s1195_s15, 4  ;;  %s45_s18 = sshll.u32 %s1196_s17, 4  ;;  %s23_s16 = int_to_ptr.vmem [resolvable:$true] %s22_s16  ;;  %s46_s18 = int_to_ptr.vmem [resolvable:$true] %s45_s18 }
  0x16   :  { %s1096_s21 = scalar_lea.hbm %s1388_s0, 64 }
  0x17   :  { %p1097_p8 = scmp.ne.s32.totalorder %s1388_s0, %s1096_s21  ;;  %p1100_p9 = scmp.lt.u32.totalorder %s1096_s21, %s1388_s0 }
  0x19   :  { %p1102_p10 = pnand %p1100_p9, %p1097_p8 }
  0x1b   :  { %1105 = shalt.err (!%p1102_p10)
}
  0x1c   :  { %s1106_s1 = scalar_lea.vmem %s23_s16, 64  ;;  %p1111_p12 = scmp.lt.s32.totalorder %s23_s16, %s23_s16 }
  0x1d   :  { %p1107_p11 = scmp.ne.s32.totalorder %s23_s16, %s1106_s1  ;;  %p1112_p13 = scmp.lt.s32.totalorder %s1106_s1, %s1106_s1 }
  0x1f   :  { %p1113_p0 = por %p1112_p13, %p1111_p12 }
  0x21   :  { %p1114_p1 = pnand %p1113_p0, %p1107_p11 }
  0x23   :  { %1117 = shalt.err (!%p1114_p1)
}
  0x24   :  { %25 = dma.hbm_to_vmem [thread:$0]  %s1388_s0, 64, %s23_s16, [#allocation3]  }
  0x25   :  { %s1118_s30 = scalar_lea.hbm %s1391_s3, 4096 }
  0x26   :  { %p1119_p2 = scmp.ne.s32.totalorder %s1391_s3, %s1118_s30  ;;  %p1122_p3 = scmp.lt.u32.totalorder %s1118_s30, %s1391_s3 }
  0x28   :  { %p1124_p4 = pnand %p1122_p3, %p1119_p2 }
  0x2a   :  { %1127 = shalt.err (!%p1124_p4)
}
  0x2b   :  { %s1128_s14 = scalar_lea.vmem %s46_s18, 4096  ;;  %p1133_p6 = scmp.lt.s32.totalorder %s46_s18, %s46_s18 }
  0x2c   :  { %p1129_p5 = scmp.ne.s32.totalorder %s46_s18, %s1128_s14  ;;  %p1134_p7 = scmp.lt.s32.totalorder %s1128_s14, %s1128_s14 }
  0x2e   :  { %p1135_p8 = por %p1134_p7, %p1133_p6 }
  0x30   :  { %p1136_p9 = pnand %p1135_p8, %p1129_p5 }
  0x32   :  { %1139 = shalt.err (!%p1136_p9)
}
  0x33   :  { %51 = dma.hbm_to_vmem [thread:$0]  %s1391_s3, 4096, %s46_s18, [#allocation6], %s1193_s11, %s1193_s11, %s1194_s12  }
  0x34   :  { %s1197_s16 = smov [#allocation8]   ;;  %s1140_s21 = scalar_lea.hbm %s1393_s5, 1024 }
  0x35   :  { %s59_s17 = sshll.u32 %s1197_s16, 4  ;;  %p1141_p10 = scmp.ne.s32.totalorder %s1393_s5, %s1140_s21  ;;  %s60_s17 = int_to_ptr.vmem [resolvable:$true] %s59_s17 }
  0x36   :  { %p1144_p11 = scmp.lt.u32.totalorder %s1140_s21, %s1393_s5 }
  0x38   :  { %p1146_p12 = pnand %p1144_p11, %p1141_p10 }
  0x3a   :  { %1149 = shalt.err (!%p1146_p12)
}
  0x3b   :  { %s1150_s1 = scalar_lea.vmem %s60_s17, 1024  ;;  %p1155_p0 = scmp.lt.s32.totalorder %s60_s17, %s60_s17 }
  0x3c   :  { %p1151_p13 = scmp.ne.s32.totalorder %s60_s17, %s1150_s1  ;;  %p1156_p1 = scmp.lt.s32.totalorder %s1150_s1, %s1150_s1 }
  0x3e   :  { %p1157_p2 = por %p1156_p1, %p1155_p0 }
  0x40   :  { %p1158_p3 = pnand %p1157_p2, %p1151_p13 }
  0x42   :  { %1161 = shalt.err (!%p1158_p3)
}
  0x43   :  { %65 = dma.hbm_to_vmem [thread:$0]  %s1393_s5, 1024, %s60_s17, [#allocation9], %s1193_s11, %s1193_s11, %s1194_s12  }
  0x44   :  { %1184 = dma.done.wait [#allocation3], 64  }
  0x45   :  { %1185 = vsyncadd [#allocation3], 4294967232 }
  0x46   :  { %1186 = dma.done.wait [#allocation6], 5120  }
  0x47   :  { %1187 = vsyncadd [#allocation6], 4294962176 }
  0x48   :  { %1188 = dma.done.wait [#allocation9], 1024  }
  0x49   :  { %1189 = vsyncadd [#allocation9], 4294966272  ;;  %v1198_v0 = vmov 0.0   ;;  %vm1199_vm0 = vmmov 0   ;;  %v1026_v1 = vld [vmem:[#allocation5] sm:$0xff]   ;;  %v1027_v2 = vld [vmem:[#allocation5 + $0x8] sm:$0xff]  }
  0x4a   :  { %897 = vmatprep.subr.bf16.mxu0 %v1198_v0  ;;  %913 = vmatprep.mubr.msk.bf16.mxu0 %vm1199_vm0, %v1198_v0  ;;  %v1028_v3 = vld [vmem:[#allocation5 + $0x10] sm:$0xff]   ;;  %v1034_v4 = vld [vmem:[#allocation7] sm:$0xff]   ;;  %v1029_v5 = vld [vmem:[#allocation5 + $0x18] sm:$0xff]   ;;  %s1200_s13 = smov [#allocation10]  }
  0x4b   :  { %917 = vmatprep.subr.bf16.mxu1 %v1198_v0  ;;  %933 = vmatprep.mubr.msk.bf16.mxu1 %vm1199_vm0, %v1198_v0  ;;  %v1035_v6 = vld [vmem:[#allocation7 + $0x8] sm:$0xff]   ;;  %v1030_v7 = vld [vmem:[#allocation5 + $0x20] sm:$0xff]   ;;  %v1036_v8 = vld [vmem:[#allocation7 + $0x10] sm:$0xff]   ;;  %s775_s14 = sshll.u32 %s1200_s13, 4  ;;  %s776_s14 = int_to_ptr.vmem [resolvable:$true] %s775_s14 }
  0x4c   :  { %898 = vmatpush3.bf16.msra.mxu0 %v1026_v1  ;;  %918 = vmatpush3.bf16.msra.mxu1 %v1034_v4  ;;  %v1031_v9 = vld [vmem:[#allocation5 + $0x28] sm:$0xff]   ;;  %v1037_v10 = vld [vmem:[#allocation7 + $0x18] sm:$0xff]   ;;  %v1032_v11 = vld [vmem:[#allocation5 + $0x30] sm:$0xff]   ;;  %p1167_p5 = scmp.lt.s32.totalorder %s776_s14, %s776_s14 }
  0x4d   :  { %899 = vmatprep.subr.bf16.mxu0 %v1198_v0  ;;  %919 = vmatprep.subr.bf16.mxu1 %v1198_v0  ;;  %v1038_v12 = vld [vmem:[#allocation7 + $0x20] sm:$0xff]   ;;  %v1033_v13 = vld [vmem:[#allocation5 + $0x38] sm:$0xff]   ;;  %v1039_v14 = vld [vmem:[#allocation7 + $0x28] sm:$0xff]  }
  0x4e   :  { %v81_v15 = vld [vmem:[#allocation2] sm:$0xf]  ;;  %v1040_v16 = vld [vmem:[#allocation7 + $0x30] sm:$0xff]   ;;  %v1042_v18 = vld [vmem:[#allocation7 + $0x40] sm:$0xff]  }
  0x4f   :  { %v1041_v17 = vld [vmem:[#allocation7 + $0x38] sm:$0xff]   ;;  %v1043_v19 = vld [vmem:[#allocation7 + $0x48] sm:$0xff]   ;;  %v1044_v20 = vld [vmem:[#allocation7 + $0x50] sm:$0xff]  }
  0x50   :  { %900 = vmatpush3.bf16.msra.mxu0 %v1027_v2  ;;  %920 = vmatpush3.bf16.msra.mxu1 %v1035_v6  ;;  %v1045_v21 = vld [vmem:[#allocation7 + $0x58] sm:$0xff]   ;;  %v1046_v22 = vld [vmem:[#allocation7 + $0x60] sm:$0xff]   ;;  %v1047_v23 = vld [vmem:[#allocation7 + $0x68] sm:$0xff]  }
  0x51   :  { %901 = vmatprep.subr.bf16.mxu0 %v1198_v0  ;;  %921 = vmatprep.subr.bf16.mxu1 %v1198_v0  ;;  %v786_v24 = vld [vmem:[%s1390_s2] ss:$0 sm:$0xff]  ;;  %v1048_v32 = vld [vmem:[#allocation7 + $0x70] sm:$0xff]   ;;  %v1050_v34 = vld [vmem:[#allocation7 + $0x80] sm:$0xff]  }
  0x52   :  { %v1049_v33 = vld [vmem:[#allocation7 + $0x78] sm:$0xff]   ;;  %v1051_v35 = vld [vmem:[#allocation7 + $0x88] sm:$0xff]   ;;  %v1052_v36 = vld [vmem:[#allocation7 + $0x90] sm:$0xff]  }
  0x53   :  { %v1053_v37 = vld [vmem:[#allocation7 + $0x98] sm:$0xff]   ;;  %v1054_v38 = vld [vmem:[#allocation7 + $0xa0] sm:$0xff]   ;;  %v1055_v39 = vld [vmem:[#allocation7 + $0xa8] sm:$0xff]  }
  0x54   :  { %902 = vmatpush3.bf16.msra.mxu0 %v1028_v3  ;;  %922 = vmatpush3.bf16.msra.mxu1 %v1036_v8  ;;  %v795_v40 = vld [vmem:[%s1392_s4] ss:$0 sm:$0xff]  ;;  %v1056_v49 = vld [vmem:[#allocation7 + $0xb0] sm:$0xff]   ;;  %v1058_v51 = vld [vmem:[#allocation7 + $0xc0] sm:$0xff]  }
  0x55   :  { %903 = vmatprep.subr.bf16.mxu0 %v1198_v0  ;;  %923 = vmatprep.subr.bf16.mxu1 %v1198_v0  ;;  %v1057_v50 = vld [vmem:[#allocation7 + $0xb8] sm:$0xff]   ;;  %v1059_v52 = vld [vmem:[#allocation7 + $0xc8] sm:$0xff]   ;;  %v1060_v53 = vld [vmem:[#allocation7 + $0xd0] sm:$0xff]  }
  0x56   :  { %v1061_v54 = vld [vmem:[#allocation7 + $0xd8] sm:$0xff]   ;;  %v1062_v55 = vld [vmem:[#allocation7 + $0xe0] sm:$0xff]   ;;  %v1063_v56 = vld [vmem:[#allocation7 + $0xe8] sm:$0xff]  }
  0x57   :  { %v805_v57 = vld [vmem:[%s1392_s4 + $0x1] ss:$0 sm:$0xff]  ;;  %v1064_v3 = vld [vmem:[#allocation7 + $0xf0] sm:$0xff]   ;;  %v1067_v6 = vld [vmem:[#allocation8 + $0x8] sm:$0xff]  }
  0x58   :  { %904 = vmatpush3.bf16.msra.mxu0 %v1029_v5  ;;  %924 = vmatpush3.bf16.msra.mxu1 %v1037_v10  ;;  %v1065_v4 = vld [vmem:[#allocation7 + $0xf8] sm:$0xff]   ;;  %v1066_v5 = vld [vmem:[#allocation8] sm:$0xff]   ;;  %v1071_v10 = vld [vmem:[#allocation8 + $0x28] sm:$0xff]  }
  0x59   :  { %905 = vmatprep.subr.bf16.mxu0 %v1198_v0  ;;  %925 = vmatprep.subr.bf16.mxu1 %v1198_v0  ;;  %v1069_v8 = vld [vmem:[#allocation8 + $0x18] sm:$0xff]  }
  0x5c   :  { %906 = vmatpush3.bf16.msra.mxu0 %v1030_v7  ;;  %926 = vmatpush3.bf16.msra.mxu1 %v1038_v12  ;;  %v1068_v7 = vld [vmem:[#allocation8 + $0x10] sm:$0xff]  }
  0x5d   :  { %907 = vmatprep.subr.bf16.mxu0 %v1198_v0  ;;  %927 = vmatprep.subr.bf16.mxu1 %v1198_v0 }
  0x60   :  { %908 = vmatpush3.bf16.msra.mxu0 %v1031_v9  ;;  %928 = vmatpush3.bf16.msra.mxu1 %v1039_v14  ;;  %v1070_v9 = vld [vmem:[#allocation8 + $0x20] sm:$0xff]  }
  0x61   :  { %909 = vmatprep.subr.bf16.mxu0 %v1198_v0  ;;  %929 = vmatprep.subr.bf16.mxu1 %v1198_v0 }
  0x64   :  { %910 = vmatpush3.bf16.msra.mxu0 %v1032_v11  ;;  %930 = vmatpush3.bf16.msra.mxu1 %v1040_v16  ;;  %v815_v11 = vld [vmem:[%s1392_s4 + $0x2] ss:$0 sm:$0xff] }
  0x65   :  { %911 = vmatprep.subr.bf16.mxu0 %v1198_v0  ;;  %931 = vmatprep.subr.bf16.mxu1 %v1198_v0 }
  0x68   :  { %912 = vmatpush3.bf16.msra.mxu0 %v1033_v13  ;;  %932 = vmatpush3.bf16.msra.mxu1 %v1041_v17 }
  0x69   :  { %937 = vmatprep.subr.bf16.mxu0 %v1198_v0  ;;  %957 = vmatprep.subr.bf16.mxu1 %v1198_v0 }
  0x6b   :  { %914 = vmatmul.mubr.bf16.vlgmr.msra.gmra.mrb[0].mxu0 %v81_v15 }
  0x6c   :  { %953 = vmatprep.mubr.msk.bf16.mxu0 %vm1199_vm0, %v1198_v0  ;;  %938 = vmatpush3.bf16.msra.mxu0 %v1042_v18 }
  0x6d   :  { %939 = vmatprep.subr.bf16.mxu0 %v1198_v0 }
  0x70   :  { %940 = vmatpush3.bf16.msra.mxu0 %v1043_v19 }
  0x71   :  { %941 = vmatprep.subr.bf16.mxu0 %v1198_v0 }
  0x74   :  { %942 = vmatpush3.bf16.msra.mxu0 %v1044_v20  ;;  %v1072_v20 = vld [vmem:[#allocation8 + $0x30] sm:$0xff]  }
  0x75   :  { %943 = vmatprep.subr.bf16.mxu0 %v1198_v0 }
  0x78   :  { %944 = vmatpush3.bf16.msra.mxu0 %v1045_v21  ;;  %v1073_v21 = vld [vmem:[#allocation8 + $0x38] sm:$0xff]  }
  0x79   :  { %945 = vmatprep.subr.bf16.mxu0 %v1198_v0 }
  0x7c   :  { %946 = vmatpush3.bf16.msra.mxu0 %v1046_v22  ;;  %v825_v22 = vld [vmem:[%s1392_s4 + $0x3] ss:$0 sm:$0xff]  ;;  %s1162_s4 = scalar_lea.vmem %s776_s14, 128 }
  0x7d   :  { %947 = vmatprep.subr.bf16.mxu0 %v1198_v0  ;;  %p1163_p4 = scmp.ne.s32.totalorder %s776_s14, %s1162_s4  ;;  %p1168_p6 = scmp.lt.s32.totalorder %s1162_s4, %s1162_s4 }
  0x7f   :  { %p1169_p7 = por %p1168_p6, %p1167_p5 }
  0x80   :  { %948 = vmatpush3.bf16.msra.mxu0 %v1047_v23 }
  0x81   :  { %949 = vmatprep.subr.bf16.mxu0 %v1198_v0  ;;  %p1170_p8 = pnand %p1169_p7, %p1163_p4 }
  0x84   :  { %950 = vmatpush3.bf16.msra.mxu0 %v1048_v32 }
  0x85   :  { %951 = vmatprep.subr.bf16.mxu0 %v1198_v0 }
  0x88   :  { %952 = vmatpush3.bf16.msra.mxu0 %v1049_v33 }
  0x89   :  { %977 = vmatprep.subr.bf16.mxu0 %v1198_v0 }
 0x13e   :  { %v187_v25 = vpop.f32.mrb[0].mxu0 }
 0x13f   :  { %v188_v26 = vadd.f32 %v786_v24, %v187_v25  ;;  %v915_v27 = vpop.f32.mrb[1].mxu0 }
 0x140   :  { %v190_v28 = vpop.f32.mrb[2].mxu0 }
 0x141   :  { %v193_v29 = vmax.f32 %v188_v26, 0.0  ;;  %v916_v30 = vpop.f32.mrb[3].mxu0 }
 0x143   :  { %v194_v31 = vpack.c.bf16 %v193_v29, %v193_v29 }
 0x145   :  { %934 = vmatmul.mubr.bf16.vlgmr.msra.gmra.mrb[0].mxu1 %v194_v31  ;;  %v834_v31 = vld [vmem:[%s1394_s6] ss:$0 sm:$0xff] }
 0x146   :  { %973 = vmatprep.mubr.msk.bf16.mxu1 %vm1199_vm0, %v1198_v0  ;;  %958 = vmatpush3.bf16.msra.mxu1 %v1050_v34 }
 0x147   :  { %959 = vmatprep.subr.bf16.mxu1 %v1198_v0 }
 0x14a   :  { %960 = vmatpush3.bf16.msra.mxu1 %v1051_v35 }
 0x14b   :  { %961 = vmatprep.subr.bf16.mxu1 %v1198_v0 }
 0x14e   :  { %962 = vmatpush3.bf16.msra.mxu1 %v1052_v36 }
 0x14f   :  { %963 = vmatprep.subr.bf16.mxu1 %v1198_v0 }
 0x152   :  { %964 = vmatpush3.bf16.msra.mxu1 %v1053_v37 }
 0x153   :  { %965 = vmatprep.subr.bf16.mxu1 %v1198_v0 }
 0x156   :  { %966 = vmatpush3.bf16.msra.mxu1 %v1054_v38 }
 0x157   :  { %967 = vmatprep.subr.bf16.mxu1 %v1198_v0 }
 0x15a   :  { %968 = vmatpush3.bf16.msra.mxu1 %v1055_v39 }
 0x15b   :  { %969 = vmatprep.subr.bf16.mxu1 %v1198_v0 }
 0x15e   :  { %970 = vmatpush3.bf16.msra.mxu1 %v1056_v49 }
 0x15f   :  { %971 = vmatprep.subr.bf16.mxu1 %v1198_v0 }
 0x162   :  { %972 = vmatpush3.bf16.msra.mxu1 %v1057_v50 }
 0x163   :  { %997 = vmatprep.subr.bf16.mxu1 %v1198_v0 }
 0x218   :  { %v300_v41 = vpop.f32.mrb[0].mxu1 }
 0x219   :  { %v301_v42 = vadd.f32 %v795_v40, %v300_v41  ;;  %v935_v43 = vpop.f32.mrb[1].mxu1 }
 0x21a   :  { %v303_v44 = vpop.f32.mrb[2].mxu1 }
 0x21b   :  { %v306_v45 = vmax.f32 %v301_v42, 0.0  ;;  %v936_v46 = vpop.f32.mrb[3].mxu1 }
 0x21d   :  { %v307_v47 = vadd.f32 %v306_v45, %v193_v29 }
 0x21f   :  { %v308_v48 = vpack.c.bf16 %v307_v47, %v307_v47 }
 0x221   :  { %954 = vmatmul.mubr.bf16.vlgmr.msra.gmra.mrb[4].mxu0 %v308_v48 }
 0x222   :  { %993 = vmatprep.mubr.msk.bf16.mxu0 %vm1199_vm0, %v1198_v0  ;;  %978 = vmatpush3.bf16.msra.mxu0 %v1058_v51 }
 0x223   :  { %979 = vmatprep.subr.bf16.mxu0 %v1198_v0 }
 0x226   :  { %980 = vmatpush3.bf16.msra.mxu0 %v1059_v52 }
 0x227   :  { %981 = vmatprep.subr.bf16.mxu0 %v1198_v0 }
 0x22a   :  { %982 = vmatpush3.bf16.msra.mxu0 %v1060_v53 }
 0x22b   :  { %983 = vmatprep.subr.bf16.mxu0 %v1198_v0 }
 0x22e   :  { %984 = vmatpush3.bf16.msra.mxu0 %v1061_v54 }
 0x22f   :  { %985 = vmatprep.subr.bf16.mxu0 %v1198_v0 }
 0x232   :  { %986 = vmatpush3.bf16.msra.mxu0 %v1062_v55 }
 0x233   :  { %987 = vmatprep.subr.bf16.mxu0 %v1198_v0 }
 0x236   :  { %988 = vmatpush3.bf16.msra.mxu0 %v1063_v56 }
 0x237   :  { %989 = vmatprep.subr.bf16.mxu0 %v1198_v0 }
 0x23a   :  { %990 = vmatpush3.bf16.msra.mxu0 %v1064_v3 }
 0x23b   :  { %991 = vmatprep.subr.bf16.mxu0 %v1198_v0 }
 0x23e   :  { %992 = vmatpush3.bf16.msra.mxu0 %v1065_v4 }
 0x2f4   :  { %v416_v58 = vpop.f32.mrb[4].mxu0 }
 0x2f5   :  { %v417_v59 = vadd.f32 %v805_v57, %v416_v58  ;;  %v955_v60 = vpop.f32.mrb[5].mxu0 }
 0x2f6   :  { %v419_v61 = vpop.f32.mrb[6].mxu0 }
 0x2f7   :  { %v422_v62 = vmax.f32 %v417_v59, 0.0  ;;  %v956_v63 = vpop.f32.mrb[7].mxu0 }
 0x2f9   :  { %v423_v1 = vadd.f32 %v422_v62, %v307_v47 }
 0x2fb   :  { %v424_v2 = vpack.c.bf16 %v423_v1, %v423_v1 }
 0x2fd   :  { %974 = vmatmul.mubr.bf16.vlgmr.msra.gmra.mrb[4].mxu1 %v424_v2 }
 0x2fe   :  { %1013 = vmatprep.mubr.msk.bf16.mxu1 %vm1199_vm0, %v1198_v0  ;;  %998 = vmatpush3.bf16.msra.mxu1 %v1066_v5 }
 0x2ff   :  { %999 = vmatprep.subr.bf16.mxu1 %v1198_v0 }
 0x302   :  { %1000 = vmatpush3.bf16.msra.mxu1 %v1067_v6 }
 0x303   :  { %1001 = vmatprep.subr.bf16.mxu1 %v1198_v0 }
 0x306   :  { %1002 = vmatpush3.bf16.msra.mxu1 %v1068_v7 }
 0x307   :  { %1003 = vmatprep.subr.bf16.mxu1 %v1198_v0 }
 0x30a   :  { %1004 = vmatpush3.bf16.msra.mxu1 %v1069_v8 }
 0x30b   :  { %1005 = vmatprep.subr.bf16.mxu1 %v1198_v0 }
 0x30e   :  { %1006 = vmatpush3.bf16.msra.mxu1 %v1070_v9 }
 0x30f   :  { %1007 = vmatprep.subr.bf16.mxu1 %v1198_v0 }
 0x312   :  { %1008 = vmatpush3.bf16.msra.mxu1 %v1071_v10 }
 0x313   :  { %1009 = vmatprep.subr.bf16.mxu1 %v1198_v0 }
 0x316   :  { %1010 = vmatpush3.bf16.msra.mxu1 %v1072_v20 }
 0x317   :  { %1011 = vmatprep.subr.bf16.mxu1 %v1198_v0 }
 0x31a   :  { %1012 = vmatpush3.bf16.msra.mxu1 %v1073_v21 }
 0x3d0   :  { %v532_v12 = vpop.f32.mrb[4].mxu1 }
 0x3d1   :  { %v533_v13 = vadd.f32 %v815_v11, %v532_v12  ;;  %v975_v14 = vpop.f32.mrb[5].mxu1 }
 0x3d2   :  { %v535_v15 = vpop.f32.mrb[6].mxu1 }
 0x3d3   :  { %v538_v16 = vmax.f32 %v533_v13, 0.0  ;;  %v976_v17 = vpop.f32.mrb[7].mxu1 }
 0x3d5   :  { %v539_v18 = vadd.f32 %v538_v16, %v423_v1 }
 0x3d7   :  { %v540_v19 = vpack.c.bf16 %v539_v18, %v539_v18 }
 0x3d9   :  { %994 = vmatmul.mubr.bf16.vlgmr.msra.gmra.mrb[8].mxu0 %v540_v19 }
 0x4ac   :  { %v648_v23 = vpop.f32.mrb[8].mxu0 }
 0x4ad   :  { %v649_v24 = vadd.f32 %v825_v22, %v648_v23  ;;  %v995_v25 = vpop.f32.mrb[9].mxu0 }
 0x4ae   :  { %v651_v26 = vpop.f32.mrb[10].mxu0 }
 0x4af   :  { %v654_v27 = vmax.f32 %v649_v24, 0.0  ;;  %v996_v28 = vpop.f32.mrb[11].mxu0 }
 0x4b1   :  { %v655_v29 = vadd.f32 %v654_v27, %v539_v18 }
 0x4b3   :  { %v656_v30 = vpack.c.bf16 %v655_v29, %v655_v29 }
 0x4b5   :  { %1014 = vmatmul.mubr.bf16.vlgmr.msra.gmra.mrb[8].mxu1 %v656_v30 }
 0x588   :  { %v762_v0 = vpop.f32.mrb[8].mxu1 }
 0x589   :  { %v763_v32 = vadd.f32 %v834_v31, %v762_v0  ;;  %v1015_v33 = vpop.f32.mrb[9].mxu1 }
 0x58a   :  { %v765_v34 = vpop.f32.mrb[10].mxu1 }
 0x58b   :  { %768 = vst [vmem:[#allocation10] sm:$0xff] %v763_v32  ;;  %v1016_v35 = vpop.f32.mrb[11].mxu1 }
 0x58c   :  { %1173 = shalt.err (!%p1170_p8)
}
 0x58d   :  { %s1174_s6 = scalar_lea.hbm %s1395_s7, 128 }
 0x58e   :  { %p1175_p9 = scmp.ne.s32.totalorder %s1395_s7, %s1174_s6  ;;  %p1178_p10 = scmp.lt.u32.totalorder %s1174_s6, %s1395_s7 }
 0x590   :  { %p1180_p11 = pnand %p1178_p10, %p1175_p9 }
 0x592   :  { %1183 = shalt.err (!%p1180_p11)
}
 0x593   :  { %778 = dma.vmem_to_hbm [thread:$0]  %s776_s14, 128, %s1395_s7, [#allocation4]  }
 0x594   :  { %1190 = dma.done.wait [#allocation4], 128  }
 0x595   :  { %1191 = vsyncadd [#allocation4], 4294967168 }
 0x596   :  { %782 = vsyncpa [#allocation3], 1 }
 0x597   :  { %783 = vsyncpa [#allocation6], 1 }
 0x598   :  { %784 = vsyncpa [#allocation9], 1 }
 0x599   :  { %785 = vsyncpa [#allocation4], 1 }

// kernel: tpu_custom_call.1
= control target key start
LH: loop header
LB: loop body
LE: loop exit
PB: predicated region body
PF: predicated region fallthrough
CT: control target
= control target key end

     0   :  { %12 = vsyncpa [#allocation3], 0  ;;  %s1388_s0 = inlined_call_operand.hbm [shape: bf16[8,128], index: 0, kind: input, shape index: {}]   ;;  %s1389_s1 = inlined_call_operand.hbm [shape: bf16[128,128], index: 1, kind: input, shape index: {}]   ;;  %s1390_s2 = inlined_call_operand.vmem [shape: f32[1,128], index: 2, kind: input, shape index: {}]   ;;  %s1391_s3 = inlined_call_operand.hbm [shape: bf16[4,128,128], index: 3, kind: input, shape index: {}]   ;;  %s1392_s4 = inlined_call_operand.vmem [shape: f32[4,1,128], index: 4, kind: input, shape index: {}]   ;;  %s1393_s5 = inlined_call_operand.hbm [shape: bf16[128,128], index: 5, kind: input, shape index: {}]   ;;  %s1394_s6 = inlined_call_operand.vmem [shape: f32[1,128], index: 6, kind: input, shape index: {}]   ;;  %s1395_s7 = inlined_call_operand.hbm [shape: f32[8,128], index: 7, kind: output, shape index: {}]  }
   0x1   :  { %13 = vsyncpa [#allocation6], 0 }
   0x2   :  { %14 = vsyncpa [#allocation9], 0 }
   0x3   :  { %15 = vsyncpa [#allocation4], 0  ;;  %s1192_s24 = smov [#allocation5]   ;;  %s1074_s28 = scalar_lea.hbm %s1389_s1, 1024 }
   0x4   :  { %s31_s25 = sshll.u32 %s1192_s24, 4  ;;  %p1075_p0 = scmp.ne.s32.totalorder %s1389_s1, %s1074_s28  ;;  %s32_s25 = int_to_ptr.vmem [resolvable:$true] %s31_s25 }
   0x5   :  { %p1078_p1 = scmp.lt.u32.totalorder %s1074_s28, %s1389_s1 }
   0x7   :  { %p1080_p2 = pnand %p1078_p1, %p1075_p0 }
   0x9   :  { %1083 = shalt.err (!%p1080_p2)
}
   0xa   :  { %s1084_s10 = scalar_lea.vmem %s32_s25, 1024  ;;  %p1089_p4 = scmp.lt.s32.totalorder %s32_s25, %s32_s25 }
   0xb   :  { %p1085_p3 = scmp.ne.s32.totalorder %s32_s25, %s1084_s10  ;;  %p1090_p5 = scmp.lt.s32.totalorder %s1084_s10, %s1084_s10 }
   0xd   :  { %p1091_p6 = por %p1090_p5, %p1089_p4 }
   0xf   :  { %p1092_p7 = pnand %p1091_p6, %p1085_p3 }
  0x11   :  { %1095 = shalt.err (!%p1092_p7)
}
  0x12   :  { %s1193_s11 = smov 64   ;;  %s1194_s12 = smov 4  }
  0x13   :  { %37 = dma.hbm_to_vmem [thread:$0]  %s1389_s1, 1024, %s32_s25, [#allocation6], %s1193_s11, %s1193_s11, %s1194_s12  }
  0x14   :  { %s1195_s15 = smov [#allocation2]   ;;  %s1196_s17 = smov [#allocation7]  }
  0x15   :  { %s22_s16 = sshll.u32 %s1195_s15, 4  ;;  %s45_s18 = sshll.u32 %s1196_s17, 4  ;;  %s23_s16 = int_to_ptr.vmem [resolvable:$true] %s22_s16  ;;  %s46_s18 = int_to_ptr.vmem [resolvable:$true] %s45_s18 }
  0x16   :  { %s1096_s21 = scalar_lea.hbm %s1388_s0, 64 }
  0x17   :  { %p1097_p8 = scmp.ne.s32.totalorder %s1388_s0, %s1096_s21  ;;  %p1100_p9 = scmp.lt.u32.totalorder %s1096_s21, %s1388_s0 }
  0x19   :  { %p1102_p10 = pnand %p1100_p9, %p1097_p8 }
  0x1b   :  { %1105 = shalt.err (!%p1102_p10)
}
  0x1c   :  { %s1106_s1 = scalar_lea.vmem %s23_s16, 64  ;;  %p1111_p12 = scmp.lt.s32.totalorder %s23_s16, %s23_s16 }
  0x1d   :  { %p1107_p11 = scmp.ne.s32.totalorder %s23_s16, %s1106_s1  ;;  %p1112_p13 = scmp.lt.s32.totalorder %s1106_s1, %s1106_s1 }
  0x1f   :  { %p1113_p0 = por %p1112_p13, %p1111_p12 }
  0x21   :  { %p1114_p1 = pnand %p1113_p0, %p1107_p11 }
  0x23   :  { %1117 = shalt.err (!%p1114_p1)
}
  0x24   :  { %25 = dma.hbm_to_vmem [thread:$0]  %s1388_s0, 64, %s23_s16, [#allocation3]  }
  0x25   :  { %s1118_s30 = scalar_lea.hbm %s1391_s3, 4096 }
  0x26   :  { %p1119_p2 = scmp.ne.s32.totalorder %s1391_s3, %s1118_s30  ;;  %p1122_p3 = scmp.lt.u32.totalorder %s1118_s30, %s1391_s3 }
  0x28   :  { %p1124_p4 = pnand %p1122_p3, %p1119_p2 }
  0x2a   :  { %1127 = shalt.err (!%p1124_p4)
}
  0x2b   :  { %s1128_s14 = scalar_lea.vmem %s46_s18, 4096  ;;  %p1133_p6 = scmp.lt.s32.totalorder %s46_s18, %s46_s18 }
  0x2c   :  { %p1129_p5 = scmp.ne.s32.totalorder %s46_s18, %s1128_s14  ;;  %p1134_p7 = scmp.lt.s32.totalorder %s1128_s14, %s1128_s14 }
  0x2e   :  { %p1135_p8 = por %p1134_p7, %p1133_p6 }
  0x30   :  { %p1136_p9 = pnand %p1135_p8, %p1129_p5 }
  0x32   :  { %1139 = shalt.err (!%p1136_p9)
}
  0x33   :  { %51 = dma.hbm_to_vmem [thread:$0]  %s1391_s3, 4096, %s46_s18, [#allocation6], %s1193_s11, %s1193_s11, %s1194_s12  }
  0x34   :  { %s1197_s16 = smov [#allocation8]   ;;  %s1140_s21 = scalar_lea.hbm %s1393_s5, 1024 }
  0x35   :  { %s59_s17 = sshll.u32 %s1197_s16, 4  ;;  %p1141_p10 = scmp.ne.s32.totalorder %s1393_s5, %s1140_s21  ;;  %s60_s17 = int_to_ptr.vmem [resolvable:$true] %s59_s17 }
  0x36   :  { %p1144_p11 = scmp.lt.u32.totalorder %s1140_s21, %s1393_s5 }
  0x38   :  { %p1146_p12 = pnand %p1144_p11, %p1141_p10 }
  0x3a   :  { %1149 = shalt.err (!%p1146_p12)
}
  0x3b   :  { %s1150_s1 = scalar_lea.vmem %s60_s17, 1024  ;;  %p1155_p0 = scmp.lt.s32.totalorder %s60_s17, %s60_s17 }
  0x3c   :  { %p1151_p13 = scmp.ne.s32.totalorder %s60_s17, %s1150_s1  ;;  %p1156_p1 = scmp.lt.s32.totalorder %s1150_s1, %s1150_s1 }
  0x3e   :  { %p1157_p2 = por %p1156_p1, %p1155_p0 }
  0x40   :  { %p1158_p3 = pnand %p1157_p2, %p1151_p13 }
  0x42   :  { %1161 = shalt.err (!%p1158_p3)
}
  0x43   :  { %65 = dma.hbm_to_vmem [thread:$0]  %s1393_s5, 1024, %s60_s17, [#allocation9], %s1193_s11, %s1193_s11, %s1194_s12  }
  0x44   :  { %1184 = dma.done.wait [#allocation3], 64  }
  0x45   :  { %1185 = vsyncadd [#allocation3], 4294967232 }
  0x46   :  { %1186 = dma.done.wait [#allocation6], 5120  }
  0x47   :  { %1187 = vsyncadd [#allocation6], 4294962176 }
  0x48   :  { %1188 = dma.done.wait [#allocation9], 1024  }
  0x49   :  { %1189 = vsyncadd [#allocation9], 4294966272  ;;  %v1198_v0 = vmov 0.0   ;;  %vm1199_vm0 = vmmov 0   ;;  %v1026_v1 = vld [vmem:[#allocation5] sm:$0xff]   ;;  %v1027_v2 = vld [vmem:[#allocation5 + $0x8] sm:$0xff]  }
  0x4a   :  { %897 = vmatprep.subr.bf16.mxu0 %v1198_v0  ;;  %913 = vmatprep.mubr.msk.bf16.mxu0 %vm1199_vm0, %v1198_v0  ;;  %v1028_v3 = vld [vmem:[#allocation5 + $0x10] sm:$0xff]   ;;  %v1034_v4 = vld [vmem:[#allocation7] sm:$0xff]   ;;  %v1029_v5 = vld [vmem:[#allocation5 + $0x18] sm:$0xff]   ;;  %s1200_s13 = smov [#allocation10]  }
  0x4b   :  { %917 = vmatprep.subr.bf16.mxu1 %v1198_v0  ;;  %933 = vmatprep.mubr.msk.bf16.mxu1 %vm1199_vm0, %v1198_v0  ;;  %v1035_v6 = vld [vmem:[#allocation7 + $0x8] sm:$0xff]   ;;  %v1030_v7 = vld [vmem:[#allocation5 + $0x20] sm:$0xff]   ;;  %v1036_v8 = vld [vmem:[#allocation7 + $0x10] sm:$0xff]   ;;  %s775_s14 = sshll.u32 %s1200_s13, 4  ;;  %s776_s14 = int_to_ptr.vmem [resolvable:$true] %s775_s14 }
  0x4c   :  { %898 = vmatpush3.bf16.msra.mxu0 %v1026_v1  ;;  %918 = vmatpush3.bf16.msra.mxu1 %v1034_v4  ;;  %v1031_v9 = vld [vmem:[#allocation5 + $0x28] sm:$0xff]   ;;  %v1037_v10 = vld [vmem:[#allocation7 + $0x18] sm:$0xff]   ;;  %v1032_v11 = vld [vmem:[#allocation5 + $0x30] sm:$0xff]   ;;  %p1167_p5 = scmp.lt.s32.totalorder %s776_s14, %s776_s14 }
  0x4d   :  { %899 = vmatprep.subr.bf16.mxu0 %v1198_v0  ;;  %919 = vmatprep.subr.bf16.mxu1 %v1198_v0  ;;  %v1038_v12 = vld [vmem:[#allocation7 + $0x20] sm:$0xff]   ;;  %v1033_v13 = vld [vmem:[#allocation5 + $0x38] sm:$0xff]   ;;  %v1039_v14 = vld [vmem:[#allocation7 + $0x28] sm:$0xff]  }
  0x4e   :  { %v81_v15 = vld [vmem:[#allocation2] sm:$0xf]  ;;  %v1040_v16 = vld [vmem:[#allocation7 + $0x30] sm:$0xff]   ;;  %v1042_v18 = vld [vmem:[#allocation7 + $0x40] sm:$0xff]  }
  0x4f   :  { %v1041_v17 = vld [vmem:[#allocation7 + $0x38] sm:$0xff]   ;;  %v1043_v19 = vld [vmem:[#allocation7 + $0x48] sm:$0xff]   ;;  %v1044_v20 = vld [vmem:[#allocation7 + $0x50] sm:$0xff]  }
  0x50   :  { %900 = vmatpush3.bf16.msra.mxu0 %v1027_v2  ;;  %920 = vmatpush3.bf16.msra.mxu1 %v1035_v6  ;;  %v1045_v21 = vld [vmem:[#allocation7 + $0x58] sm:$0xff]   ;;  %v1046_v22 = vld [vmem:[#allocation7 + $0x60] sm:$0xff]   ;;  %v1047_v23 = vld [vmem:[#allocation7 + $0x68] sm:$0xff]  }
  0x51   :  { %901 = vmatprep.subr.bf16.mxu0 %v1198_v0  ;;  %921 = vmatprep.subr.bf16.mxu1 %v1198_v0  ;;  %v786_v24 = vld [vmem:[%s1390_s2] ss:$0 sm:$0xff]  ;;  %v1048_v32 = vld [vmem:[#allocation7 + $0x70] sm:$0xff]   ;;  %v1050_v34 = vld [vmem:[#allocation7 + $0x80] sm:$0xff]  }
  0x52   :  { %v1049_v33 = vld [vmem:[#allocation7 + $0x78] sm:$0xff]   ;;  %v1051_v35 = vld [vmem:[#allocation7 + $0x88] sm:$0xff]   ;;  %v1052_v36 = vld [vmem:[#allocation7 + $0x90] sm:$0xff]  }
  0x53   :  { %v1053_v37 = vld [vmem:[#allocation7 + $0x98] sm:$0xff]   ;;  %v1054_v38 = vld [vmem:[#allocation7 + $0xa0] sm:$0xff]   ;;  %v1055_v39 = vld [vmem:[#allocation7 + $0xa8] sm:$0xff]  }
  0x54   :  { %902 = vmatpush3.bf16.msra.mxu0 %v1028_v3  ;;  %922 = vmatpush3.bf16.msra.mxu1 %v1036_v8  ;;  %v795_v40 = vld [vmem:[%s1392_s4] ss:$0 sm:$0xff]  ;;  %v1056_v49 = vld [vmem:[#allocation7 + $0xb0] sm:$0xff]   ;;  %v1058_v51 = vld [vmem:[#allocation7 + $0xc0] sm:$0xff]  }
  0x55   :  { %903 = vmatprep.subr.bf16.mxu0 %v1198_v0  ;;  %923 = vmatprep.subr.bf16.mxu1 %v1198_v0  ;;  %v1057_v50 = vld [vmem:[#allocation7 + $0xb8] sm:$0xff]   ;;  %v1059_v52 = vld [vmem:[#allocation7 + $0xc8] sm:$0xff]   ;;  %v1060_v53 = vld [vmem:[#allocation7 + $0xd0] sm:$0xff]  }
  0x56   :  { %v1061_v54 = vld [vmem:[#allocation7 + $0xd8] sm:$0xff]   ;;  %v1062_v55 = vld [vmem:[#allocation7 + $0xe0] sm:$0xff]   ;;  %v1063_v56 = vld [vmem:[#allocation7 + $0xe8] sm:$0xff]  }
  0x57   :  { %v805_v57 = vld [vmem:[%s1392_s4 + $0x1] ss:$0 sm:$0xff]  ;;  %v1064_v3 = vld [vmem:[#allocation7 + $0xf0] sm:$0xff]   ;;  %v1067_v6 = vld [vmem:[#allocation8 + $0x8] sm:$0xff]  }
  0x58   :  { %904 = vmatpush3.bf16.msra.mxu0 %v1029_v5  ;;  %924 = vmatpush3.bf16.msra.mxu1 %v1037_v10  ;;  %v1065_v4 = vld [vmem:[#allocation7 + $0xf8] sm:$0xff]   ;;  %v1066_v5 = vld [vmem:[#allocation8] sm:$0xff]   ;;  %v1071_v10 = vld [vmem:[#allocation8 + $0x28] sm:$0xff]  }
  0x59   :  { %905 = vmatprep.subr.bf16.mxu0 %v1198_v0  ;;  %925 = vmatprep.subr.bf16.mxu1 %v1198_v0  ;;  %v1069_v8 = vld [vmem:[#allocation8 + $0x18] sm:$0xff]  }
  0x5c   :  { %906 = vmatpush3.bf16.msra.mxu0 %v1030_v7  ;;  %926 = vmatpush3.bf16.msra.mxu1 %v1038_v12  ;;  %v1068_v7 = vld [vmem:[#allocation8 + $0x10] sm:$0xff]  }
  0x5d   :  { %907 = vmatprep.subr.bf16.mxu0 %v1198_v0  ;;  %927 = vmatprep.subr.bf16.mxu1 %v1198_v0 }
  0x60   :  { %908 = vmatpush3.bf16.msra.mxu0 %v1031_v9  ;;  %928 = vmatpush3.bf16.msra.mxu1 %v1039_v14  ;;  %v1070_v9 = vld [vmem:[#allocation8 + $0x20] sm:$0xff]  }
  0x61   :  { %909 = vmatprep.subr.bf16.mxu0 %v1198_v0  ;;  %929 = vmatprep.subr.bf16.mxu1 %v1198_v0 }
  0x64   :  { %910 = vmatpush3.bf16.msra.mxu0 %v1032_v11  ;;  %930 = vmatpush3.bf16.msra.mxu1 %v1040_v16  ;;  %v815_v11 = vld [vmem:[%s1392_s4 + $0x2] ss:$0 sm:$0xff] }
  0x65   :  { %911 = vmatprep.subr.bf16.mxu0 %v1198_v0  ;;  %931 = vmatprep.subr.bf16.mxu1 %v1198_v0 }
  0x68   :  { %912 = vmatpush3.bf16.msra.mxu0 %v1033_v13  ;;  %932 = vmatpush3.bf16.msra.mxu1 %v1041_v17 }
  0x69   :  { %937 = vmatprep.subr.bf16.mxu0 %v1198_v0  ;;  %957 = vmatprep.subr.bf16.mxu1 %v1198_v0 }
  0x6b   :  { %914 = vmatmul.mubr.bf16.vlgmr.msra.gmra.mrb[0].mxu0 %v81_v15 }
  0x6c   :  { %953 = vmatprep.mubr.msk.bf16.mxu0 %vm1199_vm0, %v1198_v0  ;;  %938 = vmatpush3.bf16.msra.mxu0 %v1042_v18 }
  0x6d   :  { %939 = vmatprep.subr.bf16.mxu0 %v1198_v0 }
  0x70   :  { %940 = vmatpush3.bf16.msra.mxu0 %v1043_v19 }
  0x71   :  { %941 = vmatprep.subr.bf16.mxu0 %v1198_v0 }
  0x74   :  { %942 = vmatpush3.bf16.msra.mxu0 %v1044_v20  ;;  %v1072_v20 = vld [vmem:[#allocation8 + $0x30] sm:$0xff]  }
  0x75   :  { %943 = vmatprep.subr.bf16.mxu0 %v1198_v0 }
  0x78   :  { %944 = vmatpush3.bf16.msra.mxu0 %v1045_v21  ;;  %v1073_v21 = vld [vmem:[#allocation8 + $0x38] sm:$0xff]  }
  0x79   :  { %945 = vmatprep.subr.bf16.mxu0 %v1198_v0 }
  0x7c   :  { %946 = vmatpush3.bf16.msra.mxu0 %v1046_v22  ;;  %v825_v22 = vld [vmem:[%s1392_s4 + $0x3] ss:$0 sm:$0xff]  ;;  %s1162_s4 = scalar_lea.vmem %s776_s14, 128 }
  0x7d   :  { %947 = vmatprep.subr.bf16.mxu0 %v1198_v0  ;;  %p1163_p4 = scmp.ne.s32.totalorder %s776_s14, %s1162_s4  ;;  %p1168_p6 = scmp.lt.s32.totalorder %s1162_s4, %s1162_s4 }
  0x7f   :  { %p1169_p7 = por %p1168_p6, %p1167_p5 }
  0x80   :  { %948 = vmatpush3.bf16.msra.mxu0 %v1047_v23 }
  0x81   :  { %949 = vmatprep.subr.bf16.mxu0 %v1198_v0  ;;  %p1170_p8 = pnand %p1169_p7, %p1163_p4 }
  0x84   :  { %950 = vmatpush3.bf16.msra.mxu0 %v1048_v32 }
  0x85   :  { %951 = vmatprep.subr.bf16.mxu0 %v1198_v0 }
  0x88   :  { %952 = vmatpush3.bf16.msra.mxu0 %v1049_v33 }
  0x89   :  { %977 = vmatprep.subr.bf16.mxu0 %v1198_v0 }
 0x13e   :  { %v187_v25 = vpop.f32.mrb[0].mxu0 }
 0x13f   :  { %v188_v26 = vadd.f32 %v786_v24, %v187_v25  ;;  %v915_v27 = vpop.f32.mrb[1].mxu0 }
 0x140   :  { %v190_v28 = vpop.f32.mrb[2].mxu0 }
 0x141   :  { %v193_v29 = vmax.f32 %v188_v26, 0.0  ;;  %v916_v30 = vpop.f32.mrb[3].mxu0 }
 0x143   :  { %v194_v31 = vpack.c.bf16 %v193_v29, %v193_v29 }
 0x145   :  { %934 = vmatmul.mubr.bf16.vlgmr.msra.gmra.mrb[0].mxu1 %v194_v31  ;;  %v834_v31 = vld [vmem:[%s1394_s6] ss:$0 sm:$0xff] }
 0x146   :  { %973 = vmatprep.mubr.msk.bf16.mxu1 %vm1199_vm0, %v1198_v0  ;;  %958 = vmatpush3.bf16.msra.mxu1 %v1050_v34 }
 0x147   :  { %959 = vmatprep.subr.bf16.mxu1 %v1198_v0 }
 0x14a   :  { %960 = vmatpush3.bf16.msra.mxu1 %v1051_v35 }
 0x14b   :  { %961 = vmatprep.subr.bf16.mxu1 %v1198_v0 }
 0x14e   :  { %962 = vmatpush3.bf16.msra.mxu1 %v1052_v36 }
 0x14f   :  { %963 = vmatprep.subr.bf16.mxu1 %v1198_v0 }
 0x152   :  { %964 = vmatpush3.bf16.msra.mxu1 %v1053_v37 }
 0x153   :  { %965 = vmatprep.subr.bf16.mxu1 %v1198_v0 }
 0x156   :  { %966 = vmatpush3.bf16.msra.mxu1 %v1054_v38 }
 0x157   :  { %967 = vmatprep.subr.bf16.mxu1 %v1198_v0 }
 0x15a   :  { %968 = vmatpush3.bf16.msra.mxu1 %v1055_v39 }
 0x15b   :  { %969 = vmatprep.subr.bf16.mxu1 %v1198_v0 }
 0x15e   :  { %970 = vmatpush3.bf16.msra.mxu1 %v1056_v49 }
 0x15f   :  { %971 = vmatprep.subr.bf16.mxu1 %v1198_v0 }
 0x162   :  { %972 = vmatpush3.bf16.msra.mxu1 %v1057_v50 }
 0x163   :  { %997 = vmatprep.subr.bf16.mxu1 %v1198_v0 }
 0x218   :  { %v300_v41 = vpop.f32.mrb[0].mxu1 }
 0x219   :  { %v301_v42 = vadd.f32 %v795_v40, %v300_v41  ;;  %v935_v43 = vpop.f32.mrb[1].mxu1 }
 0x21a   :  { %v303_v44 = vpop.f32.mrb[2].mxu1 }
 0x21b   :  { %v306_v45 = vmax.f32 %v301_v42, 0.0  ;;  %v936_v46 = vpop.f32.mrb[3].mxu1 }
 0x21d   :  { %v307_v47 = vadd.f32 %v306_v45, %v193_v29 }
 0x21f   :  { %v308_v48 = vpack.c.bf16 %v307_v47, %v307_v47 }
 0x221   :  { %954 = vmatmul.mubr.bf16.vlgmr.msra.gmra.mrb[4].mxu0 %v308_v48 }
 0x222   :  { %993 = vmatprep.mubr.msk.bf16.mxu0 %vm1199_vm0, %v1198_v0  ;;  %978 = vmatpush3.bf16.msra.mxu0 %v1058_v51 }
 0x223   :  { %979 = vmatprep.subr.bf16.mxu0 %v1198_v0 }
 0x226   :  { %980 = vmatpush3.bf16.msra.mxu0 %v1059_v52 }
 0x227   :  { %981 = vmatprep.subr.bf16.mxu0 %v1198_v0 }
 0x22a   :  { %982 = vmatpush3.bf16.msra.mxu0 %v1060_v53 }
 0x22b   :  { %983 = vmatprep.subr.bf16.mxu0 %v1198_v0 }
 0x22e   :  { %984 = vmatpush3.bf16.msra.mxu0 %v1061_v54 }
 0x22f   :  { %985 = vmatprep.subr.bf16.mxu0 %v1198_v0 }
 0x232   :  { %986 = vmatpush3.bf16.msra.mxu0 %v1062_v55 }
 0x233   :  { %987 = vmatprep.subr.bf16.mxu0 %v1198_v0 }
 0x236   :  { %988 = vmatpush3.bf16.msra.mxu0 %v1063_v56 }
 0x237   :  { %989 = vmatprep.subr.bf16.mxu0 %v1198_v0 }
 0x23a   :  { %990 = vmatpush3.bf16.msra.mxu0 %v1064_v3 }
 0x23b   :  { %991 = vmatprep.subr.bf16.mxu0 %v1198_v0 }
 0x23e   :  { %992 = vmatpush3.bf16.msra.mxu0 %v1065_v4 }
 0x2f4   :  { %v416_v58 = vpop.f32.mrb[4].mxu0 }
 0x2f5   :  { %v417_v59 = vadd.f32 %v805_v57, %v416_v58  ;;  %v955_v60 = vpop.f32.mrb[5].mxu0 }
 0x2f6   :  { %v419_v61 = vpop.f32.mrb[6].mxu0 }
 0x2f7   :  { %v422_v62 = vmax.f32 %v417_v59, 0.0  ;;  %v956_v63 = vpop.f32.mrb[7].mxu0 }
 0x2f9   :  { %v423_v1 = vadd.f32 %v422_v62, %v307_v47 }
 0x2fb   :  { %v424_v2 = vpack.c.bf16 %v423_v1, %v423_v1 }
 0x2fd   :  { %974 = vmatmul.mubr.bf16.vlgmr.msra.gmra.mrb[4].mxu1 %v424_v2 }
 0x2fe   :  { %1013 = vmatprep.mubr.msk.bf16.mxu1 %vm1199_vm0, %v1198_v0  ;;  %998 = vmatpush3.bf16.msra.mxu1 %v1066_v5 }
 0x2ff   :  { %999 = vmatprep.subr.bf16.mxu1 %v1198_v0 }
 0x302   :  { %1000 = vmatpush3.bf16.msra.mxu1 %v1067_v6 }
 0x303   :  { %1001 = vmatprep.subr.bf16.mxu1 %v1198_v0 }
 0x306   :  { %1002 = vmatpush3.bf16.msra.mxu1 %v1068_v7 }
 0x307   :  { %1003 = vmatprep.subr.bf16.mxu1 %v1198_v0 }
 0x30a   :  { %1004 = vmatpush3.bf16.msra.mxu1 %v1069_v8 }
 0x30b   :  { %1005 = vmatprep.subr.bf16.mxu1 %v1198_v0 }
 0x30e   :  { %1006 = vmatpush3.bf16.msra.mxu1 %v1070_v9 }
 0x30f   :  { %1007 = vmatprep.subr.bf16.mxu1 %v1198_v0 }
 0x312   :  { %1008 = vmatpush3.bf16.msra.mxu1 %v1071_v10 }
 0x313   :  { %1009 = vmatprep.subr.bf16.mxu1 %v1198_v0 }
 0x316   :  { %1010 = vmatpush3.bf16.msra.mxu1 %v1072_v20 }
 0x317   :  { %1011 = vmatprep.subr.bf16.mxu1 %v1198_v0 }
 0x31a   :  { %1012 = vmatpush3.bf16.msra.mxu1 %v1073_v21 }
 0x3d0   :  { %v532_v12 = vpop.f32.mrb[4].mxu1 }
 0x3d1   :  { %v533_v13 = vadd.f32 %v815_v11, %v532_v12  ;;  %v975_v14 = vpop.f32.mrb[5].mxu1 }
 0x3d2   :  { %v535_v15 = vpop.f32.mrb[6].mxu1 }
 0x3d3   :  { %v538_v16 = vmax.f32 %v533_v13, 0.0  ;;  %v976_v17 = vpop.f32.mrb[7].mxu1 }
 0x3d5   :  { %v539_v18 = vadd.f32 %v538_v16, %v423_v1 }
 0x3d7   :  { %v540_v19 = vpack.c.bf16 %v539_v18, %v539_v18 }
 0x3d9   :  { %994 = vmatmul.mubr.bf16.vlgmr.msra.gmra.mrb[8].mxu0 %v540_v19 }
 0x4ac   :  { %v648_v23 = vpop.f32.mrb[8].mxu0 }
 0x4ad   :  { %v649_v24 = vadd.f32 %v825_v22, %v648_v23  ;;  %v995_v25 = vpop.f32.mrb[9].mxu0 }
 0x4ae   :  { %v651_v26 = vpop.f32.mrb[10].mxu0 }
 0x4af   :  { %v654_v27 = vmax.f32 %v649_v24, 0.0  ;;  %v996_v28 = vpop.f32.mrb[11].mxu0 }
 0x4b1   :  { %v655_v29 = vadd.f32 %v654_v27, %v539_v18 }
 0x4b3   :  { %v656_v30 = vpack.c.bf16 %v655_v29, %v655_v29 }
 0x4b5   :  { %1014 = vmatmul.mubr.bf16.vlgmr.msra.gmra.mrb[8].mxu1 %v656_v30 }
 0x588   :  { %v762_v0 = vpop.f32.mrb[8].mxu1 }
 0x589   :  { %v763_v32 = vadd.f32 %v834_v31, %v762_v0  ;;  %v1015_v33 = vpop.f32.mrb[9].mxu1 }
 0x58a   :  { %v765_v34 = vpop.f32.mrb[10].mxu1 }
 0x58b   :  { %768 = vst [vmem:[#allocation10] sm:$0xff] %v763_v32  ;;  %v1016_v35 = vpop.f32.mrb[11].mxu1 }
 0x58c   :  { %1173 = shalt.err (!%p1170_p8)
}
 0x58d   :  { %s1174_s6 = scalar_lea.hbm %s1395_s7, 128 }
 0x58e   :  { %p1175_p9 = scmp.ne.s32.totalorder %s1395_s7, %s1174_s6  ;;  %p1178_p10 = scmp.lt.u32.totalorder %s1174_s6, %s1395_s7 }
 0x590   :  { %p1180_p11 = pnand %p1178_p10, %p1175_p9 }
 0x592   :  { %1183 = shalt.err (!%p1180_p11)
}
 0x593   :  { %778 = dma.vmem_to_hbm [thread:$0]  %s776_s14, 128, %s1395_s7, [#allocation4]  }
 0x594   :  { %1190 = dma.done.wait [#allocation4], 128  }
 0x595   :  { %1191 = vsyncadd [#allocation4], 4294967168 }
 0x596   :  { %782 = vsyncpa [#allocation3], 1 }
 0x597   :  { %783 = vsyncpa [#allocation6], 1 }
 0x598   :  { %784 = vsyncpa [#allocation9], 1 }
 0x599   :  { %785 = vsyncpa [#allocation4], 1 }

</bundles_post_ra>
